<compile_context>
chip_gen: v5e
topology: v5e:2x2
jax: 0.10.0
libtpu: 0.0.40
codegen_flags: <defaults>
</compile_context>

<pallas_src>
import jax
import jax.numpy as jnp
from jax import lax
from jax.experimental import pallas as pl
from jax.experimental.pallas import tpu as pltpu

LN_EPS = 1e-5        # matches torch.nn.LayerNorm default / norm_epsilon=1e-5
_LANE = 128
_MAX_L_TILE = 512    # per perf review: start at 512 (fits v7x's 64 MiB VMEM)


def _round_up(x, m):
    return ((x + m - 1) // m) * m


def _choose_l_tiling(L):
    """Pick an L tile (multiple of 128, <= 512) and the padded L it divides."""
    if L <= _MAX_L_TILE:
        return L, L                    # single tile == full dim (always legal)
    for cand in (512, 384, 256, 128):
        if L % cand == 0:
            return cand, L
    return _MAX_L_TILE, _round_up(L, _MAX_L_TILE)


def _make_kernel(c_true):
    inv_c = 1.0 / float(c_true)

    def kernel(x_ref, g_ref, b_ref, o_ref):
        # x_ref: (1, Cp, Lt) slab of one batch element, channels-major.
        # g_ref/b_ref: (1, Cp) LayerNorm affine params (resident across grid).
        # o_ref: (1, Lt, Cp) lane-dense output tile.
        x = x_ref[0].astype(jnp.float32)                  # (Cp, Lt)

        # One-pass LN stats over the channel (sublane) axis, computed *before*
        # the transpose.  Padded channel rows are zero, so the sums are exact
        # for the true channel count c_true.
        s1 = jnp.sum(x, axis=0, keepdims=True)            # (1, Lt)
        s2 = jnp.sum(x * x, axis=0, keepdims=True)        # (1, Lt)
        mean = s1 * inv_c
        var = s2 * inv_c - mean * mean                    # biased, like torch LN
        inv = lax.rsqrt(var + LN_EPS)                     # (1, Lt)

        # Normalize in the original (C, L) layout (cheap sublane broadcasts of
        # the (1, Lt) stats), then a SINGLE data transpose into the lane-dense
        # (Lt, Cp) output layout.  (For bf16 inputs this could be done in bf16
        # on v6e/v7x; kept in f32 here for accuracy/simplicity.)
        xn = (x - mean) * inv                             # (Cp, Lt)
        xn_t = jnp.transpose(xn, (1, 0))                  # (Lt, Cp)

        gamma = g_ref[...].astype(jnp.float32)            # (1, Cp), hoisted once
        beta = b_ref[...].astype(jnp.float32)
        o_ref[0] = (xn_t * gamma + beta).astype(o_ref.dtype)

    return kernel


def flatten_transpose_layernorm(x, gamma, beta):
    """x: (B, C, H, W) -> (B, H*W, C) with LayerNorm over C (eps=1e-5)."""
    B, C, H, W = x.shape
    L = H * W
    x_flat = x.reshape(B, C, L)                           # glue: flatten(2)

    # Lane-dense channel dim: pad C to a multiple of 128 so stores are
    # unmasked vst.  gamma/beta are zero-padded (padded output cols become 0
    # and are sliced off); stats use the true C divisor.
    Cp = C if C % _LANE == 0 else _round_up(C, _LANE)
    # L tiling bounds per-step VMEM and enables double-buffered DMA overlap.
    Lt, Lp = _choose_l_tiling(L)

    if Cp != C or Lp != L:
        x_flat = jnp.pad(x_flat, ((0, 0), (0, Cp - C), (0, Lp - L)))
    gamma_p = jnp.pad(gamma.reshape(1, C), ((0, 0), (0, Cp - C)))
    beta_p = jnp.pad(beta.reshape(1, C), ((0, 0), (0, Cp - C)))

    itemsize = jnp.dtype(x.dtype).itemsize
    dbuf_bytes = 2 * 2 * Cp * Lt * itemsize               # (in + out) x 2 buffers
    vmem_limit = int(min(48 * 1024 * 1024,
                         max(32 * 1024 * 1024, 4 * dbuf_bytes)))

    out = pl.pallas_call(
        _make_kernel(C),
        out_shape=jax.ShapeDtypeStruct((B, Lp, Cp), x.dtype),
        grid_spec=pltpu.PrefetchScalarGridSpec(
            num_scalar_prefetch=0,
            grid=(B, Lp // Lt),
            in_specs=[
                pl.BlockSpec((1, Cp, Lt), lambda b, l: (b, 0, l)),
                pl.BlockSpec((1, Cp), lambda b, l: (0, 0)),   # resident params
                pl.BlockSpec((1, Cp), lambda b, l: (0, 0)),
            ],
            out_specs=pl.BlockSpec((1, Lt, Cp), lambda b, l: (b, l, 0)),
        ),
        compiler_params=pltpu.CompilerParams(
            dimension_semantics=("parallel", "parallel"),
            vmem_limit_bytes=vmem_limit,
        ),
    )(x_flat, gamma_p, beta_p)

    if Cp != C or Lp != L:
        out = out[:, :L, :C]
    return out


def reference(x, gamma, beta):
    B, C, H, W = x.shape
    xt = x.reshape(B, C, H * W).transpose(0, 2, 1).astype(jnp.float32)  # (B, L, C)
    mean = jnp.mean(xt, axis=-1, keepdims=True)
    var = jnp.mean((xt - mean) ** 2, axis=-1, keepdims=True)
    y = (xt - mean) / jnp.sqrt(var + LN_EPS) * gamma + beta
    return y.astype(x.dtype)


if __name__ == "__main__":
    # Small shapes consistent with the module: dim=32 embedding channels,
    # 32x32 spatial -> L=1024 tokens (exercises the (B, L-tile) grid: 2x2).
    B, dim, H, W = 2, 32, 32, 32

    key = jax.random.PRNGKey(0)
    kx, kg, kb = jax.random.split(key, 3)
    x = jax.random.normal(kx, (B, dim, H, W), dtype=jnp.float32)
    gamma = jax.random.normal(kg, (dim,), dtype=jnp.float32)
    beta = jax.random.normal(kb, (dim,), dtype=jnp.float32)

    out = flatten_transpose_layernorm(x, gamma, beta)
    out = jax.block_until_ready(out)

    ref = reference(x, gamma, beta)
    assert out.shape == (B, H * W, dim), out.shape
    assert jnp.allclose(out, ref, atol=1e-4, rtol=1e-5), "mismatch vs reference"

    print("KERNEL_OK")
</pallas_src>

<mosaic_0001>
module attributes {stable_mosaic.version = 11 : i64} {
  func.func @kernel(%arg0: i32, %arg1: i32, %arg2: memref<1x128x512xf32, #tpu.memory_space<vmem>>, %arg3: memref<1x128xf32, #tpu.memory_space<vmem>>, %arg4: memref<1x128xf32, #tpu.memory_space<vmem>>, %arg5: memref<1x512x128xf32, #tpu.memory_space<vmem>>) attributes {dimension_semantics = [#tpu.dimension_semantics<parallel>, #tpu.dimension_semantics<parallel>], iteration_bounds = array<i64: 2, 2>, scalar_prefetch = 0 : i64, scratch_operands = 0 : i64, tpu.core_type = #tpu.core_type<tc>, window_params = [{transform_indices = @transform_0, window_bounds = array<i64: 1, 128, 512>}, {pipeline_mode = #tpu.pipeline_mode<synchronous>, transform_indices = @transform_1, window_bounds = array<i64: 1, 128>}, {pipeline_mode = #tpu.pipeline_mode<synchronous>, transform_indices = @transform_2, window_bounds = array<i64: 1, 128>}, {transform_indices = @transform_3, window_bounds = array<i64: 1, 512, 128>}]} {
    %c0 = arith.constant 0 : index
    %c0_0 = arith.constant 0 : index
    %c0_1 = arith.constant 0 : index
    %0 = vector.load %arg2[%c0, %c0_0, %c0_1] : memref<1x128x512xf32, #tpu.memory_space<vmem>>, vector<1x128x512xf32>
    %1 = vector.shape_cast %0 : vector<1x128x512xf32> to vector<128x512xf32>
    %cst = arith.constant dense<0.000000e+00> : vector<512xf32>
    %2 = vector.multi_reduction <add>, %1, %cst [0] : vector<128x512xf32> to vector<512xf32>
    %3 = vector.shape_cast %2 : vector<512xf32> to vector<1x512xf32>
    %4 = arith.mulf %1, %1 : vector<128x512xf32>
    %cst_2 = arith.constant dense<0.000000e+00> : vector<512xf32>
    %5 = vector.multi_reduction <add>, %4, %cst_2 [0] : vector<128x512xf32> to vector<512xf32>
    %6 = vector.shape_cast %5 : vector<512xf32> to vector<1x512xf32>
    %cst_3 = arith.constant 3.125000e-02 : f32
    %7 = vector.broadcast %cst_3 : f32 to vector<1x512xf32>
    %8 = arith.mulf %3, %7 : vector<1x512xf32>
    %cst_4 = arith.constant 3.125000e-02 : f32
    %9 = vector.broadcast %cst_4 : f32 to vector<1x512xf32>
    %10 = arith.mulf %6, %9 : vector<1x512xf32>
    %11 = arith.mulf %8, %8 : vector<1x512xf32>
    %12 = arith.subf %10, %11 : vector<1x512xf32>
    %cst_5 = arith.constant 9.99999974E-6 : f32
    %13 = vector.broadcast %cst_5 : f32 to vector<1x512xf32>
    %14 = arith.addf %12, %13 : vector<1x512xf32>
    %15 = math.rsqrt %14 : vector<1x512xf32>
    %16 = vector.broadcast %8 : vector<1x512xf32> to vector<128x512xf32>
    %17 = arith.subf %1, %16 : vector<128x512xf32>
    %18 = vector.broadcast %15 : vector<1x512xf32> to vector<128x512xf32>
    %19 = arith.mulf %17, %18 : vector<128x512xf32>
    %20 = tpu.transpose %19, [1, 0] : vector<128x512xf32> -> vector<512x128xf32>
    %c0_6 = arith.constant 0 : index
    %c0_7 = arith.constant 0 : index
    %21 = vector.load %arg3[%c0_6, %c0_7] : memref<1x128xf32, #tpu.memory_space<vmem>>, vector<1x128xf32>
    %c0_8 = arith.constant 0 : index
    %c0_9 = arith.constant 0 : index
    %22 = vector.load %arg4[%c0_8, %c0_9] : memref<1x128xf32, #tpu.memory_space<vmem>>, vector<1x128xf32>
    %23 = vector.broadcast %21 : vector<1x128xf32> to vector<512x128xf32>
    %24 = arith.mulf %20, %23 : vector<512x128xf32>
    %25 = vector.broadcast %22 : vector<1x128xf32> to vector<512x128xf32>
    %26 = arith.addf %24, %25 : vector<512x128xf32>
    %c0_10 = arith.constant 0 : index
    %c0_11 = arith.constant 0 : index
    %c0_12 = arith.constant 0 : index
    %27 = vector.load %arg5[%c0_10, %c0_11, %c0_12] : memref<1x512x128xf32, #tpu.memory_space<vmem>>, vector<1x512x128xf32>
    %28 = vector.shape_cast %27 : vector<1x512x128xf32> to vector<512x128xf32>
    %29 = vector.shape_cast %26 : vector<512x128xf32> to vector<1x512x128xf32>
    tpu.vector_store %arg5[%c0_10, %c0_11, %c0_12], %29 {strides = array<i32>} : memref<1x512x128xf32, #tpu.memory_space<vmem>>, vector<1x512x128xf32>,
    return
  }
  func.func @transform_0(%arg0: i32, %arg1: i32) -> (i32, i32, i32) {
    %c0_i32 = arith.constant 0 : i32
    %c0_i32_0 = arith.constant 0 : i32
    return %arg0, %c0_i32, %arg1 : i32, i32, i32
  }
  func.func @transform_1(%arg0: i32, %arg1: i32) -> (i32, i32) {
    %c0_i32 = arith.constant 0 : i32
    %c0_i32_0 = arith.constant 0 : i32
    %c0_i32_1 = arith.constant 0 : i32
    return %c0_i32, %c0_i32_0 : i32, i32
  }
  func.func @transform_2(%arg0: i32, %arg1: i32) -> (i32, i32) {
    %c0_i32 = arith.constant 0 : i32
    %c0_i32_0 = arith.constant 0 : i32
    %c0_i32_1 = arith.constant 0 : i32
    return %c0_i32, %c0_i32_0 : i32, i32
  }
  func.func @transform_3(%arg0: i32, %arg1: i32) -> (i32, i32, i32) {
    %c0_i32 = arith.constant 0 : i32
    %c0_i32_0 = arith.constant 0 : i32
    return %arg0, %arg1, %c0_i32 : i32, i32, i32
  }
}

</mosaic_0001>

<bundles_post_ra>
// kernel: tpu_custom_call.1
= control target key start
LH: loop header
LB: loop body
LE: loop exit
PB: predicated region body
PF: predicated region fallthrough
CT: control target
= control target key end

     0   :  { %s2450_s0 = inlined_call_operand.hbm [shape: f32[2,128,1024], index: 0, kind: input, shape index: {}]   ;;  %s2451_s1 = inlined_call_operand.hbm [shape: f32[1,128], index: 1, kind: input, shape index: {}]   ;;  %s2452_s2 = inlined_call_operand.vmem [shape: f32[1,128], index: 2, kind: input, shape index: {}]   ;;  %s2453_s3 = inlined_call_operand.hbm [shape: f32[2,1024,128], index: 3, kind: output, shape index: {}]  }
   0x1   :  { %2479 = sst [smem:[#allocation33_spill]] %s2451_s1 }
   0x2   :  { %2480 = sst [smem:[#allocation34_spill]] %s2453_s3 }
   0x3   :  { %8 = vsyncpa [#allocation3], 0 }
   0x4   :  { %10 = vsyncpa [#allocation3 + $0x1], 0 }
   0x5   :  { %11 = vsyncpa [#allocation6], 0 }
   0x6   :  { %12 = vsyncpa [#allocation4], 0 }
   0x7   :  { %14 = vsyncpa [#allocation4 + $0x1], 0  ;;  %s1469_s12 = smov 0   ;;  %s1471_s13 = smov 0  }
   0x8   :  { %s1473_s14 = smov 0   ;;  %s1475_s15 = smov 0  }
   0x9   :  { %s1477_s16 = smov 0   ;;  %s1479_s17 = smov 0  }
   0xa   :  { %s1481_s18 = smov 0   ;;  %s1483_s19 = smov 0  }
   0xb LB: > { %2481 = sst [smem:[#allocation11_spill]] %s1413_s12  ;;  %s1156_s20 = sadd.s32 4294967295, %s1441_s19   ;;  %s1441_s19 = sphi %s1483_s19, %s2540_s19   ;;  %s1437_s18 = sphi %s1481_s18, %s2539_s18   ;;  %s1433_s17 = sphi %s1479_s17, %s2534_s17   ;;  %s1429_s16 = sphi %s1477_s16, %s2538_s16   ;;  %s1425_s15 = sphi %s1475_s15, %s2533_s15   ;;  %s1421_s14 = sphi %s1473_s14, %s2537_s14   ;;  %s1417_s13 = sphi %s1471_s13, %s2536_s13   ;;  %s1413_s12 = sphi %s1469_s12, %s2535_s12  }
   0xc   : > { %2482 = sst [smem:[#allocation12_spill]] %s1433_s17  ;;  %s1157_s21 = sadd.s32 4294967294, %s1441_s19  }
   0xd   : > { %2483 = sst [smem:[#allocation13_spill]] %s1441_s19  ;;  %p48_p0 = scmp.ne.s32.totalorder %s1421_s14, %s1417_s13 }
   0xe   : > { %p49_p1 = scmp.eq.s32.totalorder %s1441_s19, 0  ;;  %p54_p2 = scmp.ne.s32.totalorder %s1417_s13, %s1413_s12 }
   0xf   : > { %p1517_p3 = scmp.eq.s32.totalorder %s1156_s20, 0  ;;  %p122_p4 = scmp.eq.s32.totalorder %s1156_s20, 3 }
  0x10   : > { %p1521_p5 = por %p49_p1, %p48_p0  ;;  %p128_p6 = scmp.eq.s32.totalorder %s1157_s21, 3 }
  0x11   : > { %p1527_p7 = por %p1517_p3, %p54_p2  ;;  %p1531_p8 = por %p122_p4, %p48_p0 }
  0x12   : > { %p1535_p9 = por %p128_p6, %p54_p2  ;;  %p1158_p10 = scmp.ge.s32.totalorder %s1441_s19, 1 }
  0x13   : > { %s2487_s26 = scalar_select %p1531_p8, 1, 0 }
  0x14   : > { %s2489_s27 = scalar_select %p1535_p9, 1, 0 }
  0x15   : > { %2488 = sst [smem:[#allocation14_spill]] %s2487_s26  ;;  %p135_p11 = scmp.lt.s32.totalorder %s1441_s19, 5 }
  0x16   : > { %2490 = sst [smem:[#allocation15_spill]] %s2489_s27  ;;  %s1443_s5 = smov [#allocation5]  }
  0x17   : > { %s2491_s1 = sld [smem:[#allocation33_spill]]  ;;  %p1544_p12 = pnand %p1158_p10, %p135_p11 }
  0x18   : > { %s149_s6 = sshll.u32 %s1443_s5, 4  ;;  %p1196_p0 = scmp.lt.s32.totalorder %s1441_s19, 4  ;;  %s150_s6 = int_to_ptr.vmem [resolvable:$true] %s149_s6 }
  0x19   : > { %p1183_p13 = pneg %p1544_p12  ;;  %s29_s8 = sadd.s32 1, %s1433_s17 }
  0x1a   : > { %p1555_p2 = pnand %p1196_p0, %p1521_p5  ;;  %p30_p4 = scmp.ge.s32.totalorder %s29_s8, 2 }
  0x1b   : > { %p1184_p1 = pnand %p1183_p13, %p1517_p3  ;;  %s32_s9 = sadd.s32 1, %s1437_s18 }
  0x1c   : > { %s163_s10 = sand.u32 1, %s1421_s14   ;;  %s1162_s11 = sshll.u32 %s1433_s17, 2 }
  0x1d   : > { %s147_s30 = sshll.u32 %s2491_s1, 4  ;;  %s2542_s8 = smov (%p30_p4, %s29_s8), 0  ;;  %s148_s30 = int_to_ptr.hbm [resolvable:$true] %s147_s30 }
  0x1e   : > { %1186 = dma.hbm_to_vmem [thread:$0]  (!%p1184_p1), %s148_s30, 16, %s150_s6, [#allocation6]  }
  0x1f   : > { %2494 = sst [smem:[#allocation16_spill]] %s2542_s8  ;;  %s2544_s9 = smov (!%p30_p4, %s32_s9), %s1437_s18 }
  0x20   : > { %s37_s20 = ssub.s32 %s1433_s17, %s2542_s8  ;;  %p34_p6 = scmp.ge.s32.totalorder %s2544_s9, 2 }
  0x21   : > { %s1161_s21 = sshll.u32 %s163_s10, 9  ;;  %s1163_s24 = sshll.u32 %s1437_s18, 7 }
  0x22   : > { %s2546_s9 = smov (%p34_p6, %s2544_s9), 0  ;;  %s172_s28 = sadd.s32 %s1163_s24, %s1162_s11 }
  0x23   : > { %s167_s29 = scalar_lea.vmem [#allocation2], %s1161_s21  ;;  %s36_s5 = ssub.s32 %s1437_s18, %s2546_s9 }
  0x24   : > { %s177_s30 = sshll.u32 %s167_s29, 4  ;;  %s1164_s6 = sshll.u32 %s172_s28, 3  ;;  %s178_s30 = int_to_ptr.vmem [resolvable:$true] %s177_s30 }
  0x25   : > { %s38_s22 = sor.u32 %s37_s20, %s36_s5  ;;  %s174_s12 = scalar_lea.hbm %s2450_s0, %s1164_s6 }
  0x26   : > { %p39_p5 = scmp.eq.s32.totalorder %s38_s22, 0  ;;  %s175_s8 = sshll.u32 %s174_s12, 4  ;;  %s176_s8 = int_to_ptr.hbm [resolvable:$true] %s175_s8 }
  0x27   : > { %s2495_s17 = sadd.s32 1, %s1421_s14  ;;  %s164_s26 = scalar_lea.sflag [#allocation3], %s163_s10 }
  0x28   : > { %s1579_s19 = scalar_select %p39_p5, %s1421_s14, %s2495_s17  }
  0x29   : > { %s1444_s3 = smov 1024   ;;  %s1445_s11 = smov 512  }
  0x2a   : > { %s1446_s24 = smov 32   ;;  %189 = sbr.rel (%p1544_p12) target bundleno = 546 (0x222), region = 32 }
  0x2b   : > { %1190 = dma.hbm_to_vmem [thread:$0]  (!%p1555_p2), %s176_s8, 8192, %s178_s30, %s164_s26, %s1444_s3, %s1445_s11, %s1446_s24  }
  0x2f   : > { %s1586_s1 = sand.u32 1, %s1417_s13  }
  0x30   : > { %s1166_s12 = sshll.u32 %s1586_s1, 9  ;;  %s192_s22 = scalar_lea.sflag [#allocation3], %s1586_s1 }
  0x31   : > { %s1592_s17 = scalar_lea.vmem [#allocation2], %s1166_s12 }
  0x32   : > { %1400 = dma.done.wait (%p1527_p7), %s192_s22, 8192  }
  0x33   : > { %1402 = vsyncadd (%p1527_p7), %s192_s22, 4294959104 }
  0x34   : > { %1404 = dma.done.wait (%p1517_p3), [#allocation6], 16  }
  0x35   : > { %1406 = vsyncadd (%p1517_p3), [#allocation6], 4294967280  ;;  %v1603_v0 = vld [vmem:[%s1592_s17] sm:$0xff]  ;;  %s2137_s25 = scalar_lea.vmem [#allocation7], %s1166_s12  ;;  %s1170_s26 = sshll.u32 %s1425_s15, 6 }
  0x36   : > { %v1606_v1 = vld [vmem:[%s1592_s17 + $0x20] sm:$0xff]  ;;  %v374_v5 = vmul.f32 %v1603_v0, %v1603_v0  ;;  %s1171_s27 = sshll.u32 %s1429_s16, 7  ;;  %s2528_s8 = sld [smem:[#allocation34_spill]] }
  0x37   : > { %v1609_v2 = vld [vmem:[%s1592_s17 + $0x40] sm:$0xff]  ;;  %v290_v4 = vadd.f32 %v1606_v1, %v1603_v0  ;;  %v378_v6 = vmul.f32 %v1606_v1, %v1606_v1  ;;  %s1050_s4 = sadd.s32 %s1171_s27, %s1170_s26  ;;  %s1053_s21 = sshll.u32 %s2137_s25, 4  ;;  %s1054_s21 = int_to_ptr.vmem [resolvable:$true] %s1053_s21 }
  0x38   : > { %v1612_v3 = vld [vmem:[%s1592_s17 + $0x60] sm:$0xff]  ;;  %v382_v7 = vmul.f32 %v1609_v2, %v1609_v2  ;;  %s1172_s7 = sshll.u32 %s1050_s4, 3  ;;  %s1039_s29 = scalar_lea.sflag [#allocation4], %s1586_s1 }
  0x39   : > { %v1623_v8 = vld [vmem:[%s1592_s17 + $0x80] sm:$0xff]  ;;  %v291_v9 = vadd.f32 %v290_v4, %v1609_v2  ;;  %v386_v10 = vmul.f32 %v1612_v3, %v1612_v3  ;;  %v438_v11 = vadd.f32 %v378_v6, %v374_v5 }
  0x3a   : > { %v1629_v12 = vld [vmem:[%s1592_s17 + $0xa0] sm:$0xff]  ;;  %v390_v14 = vmul.f32 %v1623_v8, %v1623_v8 }
  0x3b   : > { %v292_v13 = vadd.f32 %v291_v9, %v1612_v3  ;;  %v439_v15 = vadd.f32 %v438_v11, %v382_v7  ;;  %v1635_v16 = vld [vmem:[%s1592_s17 + $0xc0] sm:$0xff]  ;;  %v394_v18 = vmul.f32 %v1629_v12, %v1629_v12 }
  0x3c   : > { %v1641_v20 = vld [vmem:[%s1592_s17 + $0xe0] sm:$0xff]  ;;  %v398_v22 = vmul.f32 %v1635_v16, %v1635_v16  ;;  %s1052_s10 = scalar_lea.hbm %s2528_s8, %s1172_s7  ;;  %s1359_s24 = scalar_lea.hbm %s2528_s8, 2048 }
  0x3d   : > { %v293_v17 = vadd.f32 %v292_v13, %v1623_v8  ;;  %v440_v19 = vadd.f32 %v439_v15, %v386_v10  ;;  %v1647_v24 = vld [vmem:[%s1592_s17 + $0x100] sm:$0xff]  ;;  %v402_v26 = vmul.f32 %v1641_v20, %v1641_v20  ;;  %s1055_s28 = sshll.u32 %s1052_s10, 4  ;;  %s1056_s28 = int_to_ptr.hbm [resolvable:$true] %s1055_s28 }
  0x3e   : > { %v1653_v28 = vld [vmem:[%s1592_s17 + $0x120] sm:$0xff]  ;;  %v406_v30 = vmul.f32 %v1647_v24, %v1647_v24  ;;  %s1353_s30 = sshra.s32 %s1056_s28, 4  ;;  %s1354_s30 = int_to_ptr.hbm [resolvable:$true] %s1353_s30 }
  0x3f   : > { %v294_v21 = vadd.f32 %v293_v17, %v1629_v12  ;;  %v441_v23 = vadd.f32 %v440_v19, %v390_v14  ;;  %v1659_v32 = vld [vmem:[%s1592_s17 + $0x140] sm:$0xff]  ;;  %v410_v34 = vmul.f32 %v1653_v28, %v1653_v28  ;;  %s1355_s5 = scalar_lea.hbm %s1354_s30, 512  ;;  %p1360_p11 = scmp.lt.s32.totalorder %s1354_s30, %s2528_s8 }
  0x40   : > { %v1665_v36 = vld [vmem:[%s1592_s17 + $0x160] sm:$0xff]  ;;  %v414_v38 = vmul.f32 %v1659_v32, %v1659_v32  ;;  %p1356_p3 = scmp.ne.s32.totalorder %s1354_s30, %s1355_s5  ;;  %p1361_p12 = scmp.lt.s32.totalorder %s1359_s24, %s1355_s5 }
  0x41   : > { %v295_v25 = vadd.f32 %v294_v21, %v1635_v16  ;;  %v442_v27 = vadd.f32 %v441_v23, %v394_v18  ;;  %v1671_v40 = vld [vmem:[%s1592_s17 + $0x180] sm:$0xff]  ;;  %v418_v42 = vmul.f32 %v1665_v36, %v1665_v36 }
  0x42   : > { %v1677_v44 = vld [vmem:[%s1592_s17 + $0x1a0] sm:$0xff]  ;;  %v422_v46 = vmul.f32 %v1671_v40, %v1671_v40  ;;  %p1357_p7 = pnand %p1356_p3, %p1531_p8  ;;  %p1362_p13 = por %p1361_p12, %p1360_p11 }
  0x43   : > { %v296_v29 = vadd.f32 %v295_v25, %v1641_v20  ;;  %v443_v31 = vadd.f32 %v442_v27, %v398_v22  ;;  %v1683_v48 = vld [vmem:[%s1592_s17 + $0x1c0] sm:$0xff]  ;;  %v426_v50 = vmul.f32 %v1677_v44, %v1677_v44 }
  0x44   : > { %v1689_v52 = vld [vmem:[%s1592_s17 + $0x1e0] sm:$0xff]  ;;  %v430_v54 = vmul.f32 %v1683_v48, %v1683_v48  ;;  %p1358_p10 = pneg %p1357_p7 }
  0x45   : > { %v297_v33 = vadd.f32 %v296_v29, %v1647_v24  ;;  %v444_v35 = vadd.f32 %v443_v31, %v402_v26  ;;  %v434_v57 = vmul.f32 %v1689_v52, %v1689_v52 }
  0x46   : > { %p1363_p0 = pnand %p1362_p13, %p1358_p10 }
  0x47   : > { %v298_v37 = vadd.f32 %v297_v33, %v1653_v28  ;;  %v445_v39 = vadd.f32 %v444_v35, %v406_v30 }
  0x49   : > { %v299_v41 = vadd.f32 %v298_v37, %v1659_v32  ;;  %v446_v43 = vadd.f32 %v445_v39, %v410_v34 }
  0x4b   : > { %v300_v45 = vadd.f32 %v299_v41, %v1665_v36  ;;  %v447_v47 = vadd.f32 %v446_v43, %v414_v38  ;;  %v1722_v43 = vld [vmem:[%s1592_s17 + $0x28] sm:$0xff] }
  0x4d   : > { %v301_v49 = vadd.f32 %v300_v45, %v1671_v40  ;;  %v448_v51 = vadd.f32 %v447_v47, %v418_v42  ;;  %v1719_v42 = vld [vmem:[%s1592_s17 + $0x8] sm:$0xff]  ;;  %v1725_v45 = vld [vmem:[%s1592_s17 + $0x18] sm:$0xff] }
  0x4e   : > { %v1734_v47 = vld [vmem:[%s1592_s17 + $0x38] sm:$0xff] }
  0x4f   : > { %v302_v53 = vadd.f32 %v301_v49, %v1677_v44  ;;  %v449_v55 = vadd.f32 %v448_v51, %v422_v46  ;;  %v379_v46 = vmul.f32 %v1722_v43, %v1722_v43  ;;  %v1738_v49 = vld [vmem:[%s1592_s17 + $0x48] sm:$0xff]  ;;  %v353_v51 = vadd.f32 %v1734_v47, %v1725_v45 }
  0x51   : > { %v303_v56 = vadd.f32 %v302_v53, %v1683_v48  ;;  %v450_v58 = vadd.f32 %v449_v55, %v426_v50  ;;  %v1741_v50 = vld [vmem:[%s1592_s17 + $0x58] sm:$0xff]  ;;  %v377_v53 = vmul.f32 %v1725_v45, %v1725_v45 }
  0x53   : > { %v304_v59 = vadd.f32 %v303_v56, %v1689_v52  ;;  %v451_v60 = vadd.f32 %v450_v58, %v430_v54  ;;  %v381_v54 = vmul.f32 %v1734_v47, %v1734_v47  ;;  %v383_v56 = vmul.f32 %v1738_v49, %v1738_v49 }
  0x54   : > { %v385_v58 = vmul.f32 %v1741_v50, %v1741_v50 }
  0x55   : > { %v305_v61 = vrot.slane %v304_v59, 4  ;;  %v452_v62 = vadd.f32 %v451_v60, %v434_v57  ;;  %v1758_v60 = vld [vmem:[%s1592_s17 + $0x78] sm:$0xff] }
  0x57   : > { %v306_v63 = vadd.f32 %v305_v61, %v304_v59  ;;  %v453_v4 = vrot.slane %v452_v62, 4  ;;  %v1755_v59 = vld [vmem:[%s1592_s17 + $0x68] sm:$0xff]  ;;  %v354_v61 = vadd.f32 %v353_v51, %v1741_v50 }
  0x59   : > { %v307_v5 = vrot.slane %v306_v63, 2  ;;  %v454_v6 = vadd.f32 %v453_v4, %v452_v62  ;;  %v501_v62 = vadd.f32 %v381_v54, %v377_v53  ;;  %v387_v4 = vmul.f32 %v1755_v59, %v1755_v59 }
  0x5b   : > { %v308_v7 = vadd.f32 %v307_v5, %v306_v63  ;;  %v455_v9 = vrot.slane %v454_v6, 2 }
  0x5d   : > { %v309_v10 = vrot.slane %v308_v7, 1  ;;  %v456_v11 = vadd.f32 %v455_v9, %v454_v6  ;;  %v389_v6 = vmul.f32 %v1758_v60, %v1758_v60  ;;  %v1769_v9 = vld [vmem:[%s1592_s17 + $0x88] sm:$0xff] }
  0x5f   : > { %v310_v13 = vadd.f32 %v309_v10, %v308_v7  ;;  %v457_v14 = vrot.slane %v456_v11, 1  ;;  %v1772_v10 = vld [vmem:[%s1592_s17 + $0x98] sm:$0xff] }
  0x61   : > { %v1698_v15 = vmul.f32 0.03125, %v310_v13  ;;  %v458_v17 = vadd.f32 %v457_v14, %v456_v11  ;;  %v355_v11 = vadd.f32 %v354_v61, %v1758_v60  ;;  %v502_v13 = vadd.f32 %v501_v62, %v385_v58  ;;  %v1828_v58 = vld [vmem:[%s1592_s17 + $0x50] sm:$0xff]  ;;  %v1831_v61 = vld [vmem:[%s1592_s17 + $0x108] sm:$0xff]  ;;  %v1834_v62 = vld [vmem:[%s1592_s17 + $0x118] sm:$0xff] }
  0x62   : > { %2498 = vst [vmem:[#allocation19_spill] sm:$0xff] %v1834_v62 }
  0x63   : > { %v530_v18 = vmul.f32 %v1698_v15, %v1698_v15  ;;  %v526_v19 = vmul.f32 0.03125, %v458_v17  ;;  %v582_v30 = vsub.f32 %v1603_v0, %v1698_v15  ;;  %v586_v35 = vsub.f32 %v1606_v1, %v1698_v15 }
  0x64   : > { %v590_v38 = vsub.f32 %v1609_v2, %v1698_v15  ;;  %v594_v39 = vsub.f32 %v1612_v3, %v1698_v15  ;;  %v598_v1 = vsub.f32 %v1623_v8, %v1698_v15  ;;  %v311_v2 = vadd.f32 %v1722_v43, %v1719_v42 }
  0x65   : > { %v534_v21 = vsub.f32 %v526_v19, %v530_v18  ;;  %v375_v3 = vmul.f32 %v1719_v42, %v1719_v42  ;;  %v602_v7 = vsub.f32 %v1629_v12, %v1698_v15  ;;  %v391_v17 = vmul.f32 %v1769_v9, %v1769_v9  ;;  %v1779_v19 = vld [vmem:[%s1592_s17 + $0xa8] sm:$0xff] }
  0x66   : > { %v312_v55 = vadd.f32 %v311_v2, %v1738_v49  ;;  %v356_v12 = vadd.f32 %v355_v11, %v1772_v10  ;;  %v1809_v2 = vld [vmem:[%s1592_s17 + $0x30] sm:$0xff] }
  0x67   : > { %v538_v22 = vadd.f32 1e-05, %v534_v21  ;;  %v459_v57 = vadd.f32 %v379_v46, %v375_v3  ;;  %v1782_v21 = vld [vmem:[%s1592_s17 + $0xb8] sm:$0xff]  ;;  %v606_v3 = vsub.f32 %v1635_v16, %v1698_v15  ;;  %v1814_v46 = vld [vmem:[%s1592_s17 + $0xe8] sm:$0xff] }
  0x68   : > { %v313_v63 = vadd.f32 %v312_v55, %v1755_v59 }
  0x69   : > { %1271 = vrsqrt.f32 %v538_v22  ;;  %vm548_vm0 = vweird.f32 %v538_v22  ;;  %v460_v5 = vadd.f32 %v459_v57, %v383_v56  ;;  %v403_v56 = vmul.f32 %v1814_v46, %v1814_v46 }
  0x6a   : > { %v314_v14 = vadd.f32 %v313_v63, %v1769_v9 }
  0x6b   : > { %v461_v18 = vadd.f32 %v460_v5, %v387_v4 }
  0x6f   : > { %v1272_v23 = vpop.eup %1271 }
  0x70   : > { %v543_v25 = vmul.f32 %v1272_v23, %v538_v22  ;;  %vm549_vm1 = vweird.f32 %v1272_v23  ;;  %v393_v22 = vmul.f32 %v1772_v10, %v1772_v10 }
  0x71   : > { %vm550_vm2 = vmor %vm548_vm0, %vm549_vm1 }
  0x72   : > { %v544_v26 = vmul.f32 %v1272_v23, %v543_v25  ;;  %v315_v25 = vadd.f32 %v314_v14, %v1779_v19  ;;  %v1845_v14 = vld [vmem:[%s1592_s17 + $0x128] sm:$0xff] }
  0x74   : > { %v545_v27 = vmul.f32 0.5, %v544_v26  ;;  %v395_v26 = vmul.f32 %v1779_v19, %v1779_v19 }
  0x76   : > { %v546_v29 = vsub.f32 1.5, %v545_v27  ;;  %v462_v27 = vadd.f32 %v461_v18, %v391_v17  ;;  %v1848_v17 = vld [vmem:[%s1592_s17 + $0x138] sm:$0xff] }
  0x77   : > { %2499 = vst [vmem:[#allocation20_spill] sm:$0xff] %v1848_v17 }
  0x78   : > { %v547_v31 = vmul.f32 %v1272_v23, %v546_v29 }
  0x7a   : > { %v1704_v33 = vsel %vm550_vm2, %v1272_v23, %v547_v31  ;;  %v503_v23 = vadd.f32 %v502_v13, %v389_v6  ;;  %v1795_v31 = vld [vmem:[%s1592_s17 + $0xd8] sm:$0xff]  ;;  %v1842_v13 = vld [vmem:[%s1592_s17 + $0x70] sm:$0xff] }
  0x7b   : > { %v646_v34 = vmul.f32 %v582_v30, %v1704_v33  ;;  %v650_v37 = vmul.f32 %v586_v35, %v1704_v33  ;;  %v654_v0 = vmul.f32 %v590_v38, %v1704_v33  ;;  %v658_v41 = vmul.f32 %v594_v39, %v1704_v33  ;;  %v1792_v30 = vld [vmem:[%s1592_s17 + $0xc8] sm:$0xff]  ;;  %2496 = vst [vmem:[#allocation17_spill] sm:$0xff] %v1795_v31 }
  0x7c   : > { %v662_v8 = vmul.f32 %v598_v1, %v1704_v33  ;;  %v666_v29 = vmul.f32 %v602_v7, %v1704_v33  ;;  %v397_v35 = vmul.f32 %v1782_v21, %v1782_v21  ;;  %v316_v38 = vadd.f32 %v315_v25, %v1792_v30  ;;  %v1806_v1 = vld [vmem:[%s1592_s17 + $0x10] sm:$0xff] }
  0x7d   : > { %710 = vxpose.xlu0.b32.start [1/16] %v646_v34, 128  ;;  %v357_v34 = vadd.f32 %v356_v12, %v1782_v21  ;;  %v463_v39 = vadd.f32 %v462_v27, %v395_v26  ;;  %v332_v54 = vadd.f32 %v1809_v2, %v1806_v1  ;;  %v407_v7 = vmul.f32 %v1831_v61, %v1831_v61 }
  0x7e   : > { %v317_v55 = vadd.f32 %v316_v38, %v1814_v46  ;;  %v409_v12 = vmul.f32 %v1834_v62, %v1834_v62  ;;  %v670_v25 = vmul.f32 %v606_v3, %v1704_v33  ;;  %v411_v27 = vmul.f32 %v1845_v14, %v1845_v14 }
  0x7f   : > { %v358_v51 = vadd.f32 %v357_v34, %v1795_v31  ;;  %v333_v5 = vadd.f32 %v332_v54, %v1828_v58  ;;  %v1859_v34 = vld [vmem:[%s1592_s17 + $0x90] sm:$0xff] }
  0x80   : > { %v318_v6 = vadd.f32 %v317_v55, %v1831_v61  ;;  %v1877_v55 = vld [vmem:[%s1592_s17 + $0xb0] sm:$0xff] }
  0x82   : > { %v319_v26 = vadd.f32 %v318_v6, %v1845_v14 }
  0x85   : > { %711 = vxpose.xlu0.b32.cont [2/16] %v650_v37, 128  ;;  %v504_v37 = vadd.f32 %v503_v23, %v393_v22  ;;  %v334_v23 = vadd.f32 %v333_v5, %v1842_v13 }
  0x87   : > { %v505_v53 = vadd.f32 %v504_v37, %v397_v35  ;;  %v1862_v35 = vld [vmem:[%s1592_s17 + $0x148] sm:$0xff]  ;;  %v1865_v37 = vld [vmem:[%s1592_s17 + $0x158] sm:$0xff] }
  0x88   : > { %2500 = vst [vmem:[#allocation21_spill] sm:$0xff] %v1862_v35  ;;  %v320_v3 = vadd.f32 %v319_v26, %v1862_v35  ;;  %v417_v54 = vmul.f32 %v1865_v37, %v1865_v37 }
  0x89   : > { %2501 = vst [vmem:[#allocation22_spill] sm:$0xff] %v1865_v37 }
  0x8d   : > { %712 = vxpose.xlu0.b32.cont [3/16] %v654_v0, 128  ;;  %v399_v0 = vmul.f32 %v1792_v30, %v1792_v30 }
  0x8f   : > { %v464_v57 = vadd.f32 %v463_v39, %v399_v0  ;;  %v413_v0 = vmul.f32 %v1848_v17, %v1848_v17 }
  0x91   : > { %v465_v11 = vadd.f32 %v464_v57, %v403_v56  ;;  %v610_v56 = vsub.f32 %v1641_v20, %v1698_v15  ;;  %v1882_v57 = vld [vmem:[%s1592_s17 + $0x168] sm:$0xff] }
  0x92   : > { %2502 = vst [vmem:[#allocation23_spill] sm:$0xff] %v1882_v57  ;;  %v321_v6 = vadd.f32 %v320_v3, %v1882_v57  ;;  %v1915_v3 = vld [vmem:[%s1592_s17 + $0x1b8] sm:$0xff] }
  0x93   : > { %2507 = vst [vmem:[#allocation28_spill] sm:$0xff] %v1915_v3 }
  0x95   : > { %713 = vxpose.xlu0.b32.cont [4/16] %v658_v41, 128  ;;  %v401_v41 = vmul.f32 %v1795_v31, %v1795_v31  ;;  %v2003_v31 = vld [vmem:[%s1592_s17 + $0x1f0] sm:$0xff] }
  0x97   : > { %v506_v4 = vadd.f32 %v505_v53, %v401_v41  ;;  %v335_v41 = vadd.f32 %v334_v23, %v1859_v34 }
  0x99   : > { %v336_v5 = vadd.f32 %v335_v41, %v1877_v55  ;;  %v1912_v41 = vld [vmem:[%s1592_s17 + $0x1a8] sm:$0xff] }
  0x9a   : > { %2506 = vst [vmem:[#allocation27_spill] sm:$0xff] %v1912_v41 }
  0x9d   : > { %714 = vxpose.xlu0.b32.cont [5/16] %v662_v8, 128  ;;  %v1817_v8 = vld [vmem:[%s1592_s17 + $0xf8] sm:$0xff] }
  0x9e   : > { %2497 = vst [vmem:[#allocation18_spill] sm:$0xff] %v1817_v8  ;;  %v405_v16 = vmul.f32 %v1817_v8, %v1817_v8  ;;  %v359_v63 = vadd.f32 %v358_v51, %v1817_v8  ;;  %v415_v51 = vmul.f32 %v1862_v35, %v1862_v35 }
  0xa0   : > { %v360_v18 = vadd.f32 %v359_v63, %v1834_v62  ;;  %v507_v22 = vadd.f32 %v506_v4, %v405_v16  ;;  %v1885_v16 = vld [vmem:[%s1592_s17 + $0x178] sm:$0xff]  ;;  %v1971_v62 = vld [vmem:[%s1592_s17 + $0x190] sm:$0xff] }
  0xa1   : > { %2503 = vst [vmem:[#allocation24_spill] sm:$0xff] %v1885_v16  ;;  %v421_v20 = vmul.f32 %v1885_v16, %v1885_v16 }
  0xa2   : > { %v361_v38 = vadd.f32 %v360_v18, %v1848_v17  ;;  %v508_v39 = vadd.f32 %v507_v22, %v409_v12  ;;  %v1895_v18 = vld [vmem:[%s1592_s17 + $0xd0] sm:$0xff]  ;;  %v1898_v12 = vld [vmem:[%s1592_s17 + $0x188] sm:$0xff]  ;;  %v1901_v22 = vld [vmem:[%s1592_s17 + $0x198] sm:$0xff] }
  0xa3   : > { %2504 = vst [vmem:[#allocation25_spill] sm:$0xff] %v1898_v12 }
  0xa4   : > { %v362_v63 = vadd.f32 %v361_v38, %v1865_v37  ;;  %v509_v4 = vadd.f32 %v508_v39, %v413_v0  ;;  %2505 = vst [vmem:[#allocation26_spill] sm:$0xff] %v1901_v22  ;;  %v423_v38 = vmul.f32 %v1898_v12, %v1898_v12  ;;  %v1909_v39 = vld [vmem:[%s1592_s17 + $0xf0] sm:$0xff]  ;;  %v1947_v37 = vld [vmem:[%s1592_s17 + $0x1e8] sm:$0xff] }
  0xa5   : > { %715 = vxpose.xlu0.b32.cont [6/16] %v666_v29, 128  ;;  %v466_v29 = vadd.f32 %v465_v11, %v407_v7  ;;  %v419_v7 = vmul.f32 %v1882_v57, %v1882_v57  ;;  %2510 = vst [vmem:[#allocation31_spill] sm:$0xff] %v1947_v37 }
  0xa6   : > { %v363_v23 = vadd.f32 %v362_v63, %v1885_v16  ;;  %v510_v26 = vadd.f32 %v509_v4, %v417_v54  ;;  %v674_v63 = vmul.f32 %v610_v56, %v1704_v33  ;;  %v1944_v16 = vld [vmem:[%s1592_s17 + $0x130] sm:$0xff] }
  0xa7   : > { %v467_v53 = vadd.f32 %v466_v29, %v411_v27  ;;  %v337_v27 = vadd.f32 %v336_v5, %v1895_v18  ;;  %v322_v29 = vadd.f32 %v321_v6, %v1898_v12  ;;  %v427_v5 = vmul.f32 %v1912_v41, %v1912_v41 }
  0xa9   : > { %v468_v11 = vadd.f32 %v467_v53, %v415_v51  ;;  %v364_v51 = vadd.f32 %v363_v23, %v1901_v22  ;;  %v425_v53 = vmul.f32 %v1901_v22, %v1901_v22  ;;  %v338_v54 = vadd.f32 %v337_v27, %v1909_v39  ;;  %v1932_v23 = vld [vmem:[%s1592_s17 + $0x1d8] sm:$0xff] }
  0xaa   : > { %v323_v4 = vadd.f32 %v322_v29, %v1912_v41  ;;  %2509 = vst [vmem:[#allocation30_spill] sm:$0xff] %v1932_v23  ;;  %v433_v22 = vmul.f32 %v1932_v23, %v1932_v23 }
  0xab   : > { %v469_v0 = vadd.f32 %v468_v11, %v419_v7  ;;  %v1926_v7 = vld [vmem:[%s1592_s17 + $0x110] sm:$0xff]  ;;  %v1929_v11 = vld [vmem:[%s1592_s17 + $0x1c8] sm:$0xff] }
  0xac   : > { %2508 = vst [vmem:[#allocation29_spill] sm:$0xff] %v1929_v11  ;;  %v339_v27 = vadd.f32 %v338_v54, %v1926_v7  ;;  %v324_v29 = vadd.f32 %v323_v4, %v1929_v11 }
  0xad   : > { %716 = vxpose.xlu0.b32.cont [7/16] %v670_v25, 128  ;;  %v511_v25 = vadd.f32 %v510_v26, %v421_v20  ;;  %v470_v6 = vadd.f32 %v469_v0, %v423_v38  ;;  %v365_v20 = vadd.f32 %v364_v51, %v1915_v3  ;;  %v429_v26 = vmul.f32 %v1915_v3, %v1915_v3  ;;  %v1950_v51 = vld [vmem:[%s1592_s17 + $0x1f8] sm:$0xff] }
  0xae   : > { %v431_v38 = vmul.f32 %v1929_v11, %v1929_v11  ;;  %2511 = vst [vmem:[#allocation32_spill] sm:$0xff] %v1950_v51  ;;  %v340_v54 = vadd.f32 %v339_v27, %v1944_v16  ;;  %v325_v4 = vadd.f32 %v324_v29, %v1947_v37  ;;  %v437_v3 = vmul.f32 %v1950_v51, %v1950_v51  ;;  %v1960_v11 = vld [vmem:[%s1592_s17 + $0x150] sm:$0xff] }
  0xaf   : > { %v512_v56 = vadd.f32 %v511_v25, %v425_v53  ;;  %v471_v0 = vadd.f32 %v470_v6, %v427_v5  ;;  %v366_v53 = vadd.f32 %v365_v20, %v1932_v23  ;;  %v435_v5 = vmul.f32 %v1947_v37, %v1947_v37  ;;  %v1967_v29 = vld [vmem:[%s1592_s17 + $0x170] sm:$0xff] }
  0xb0   : > { %v341_v20 = vadd.f32 %v340_v54, %v1960_v11 }
  0xb1   : > { %v513_v25 = vadd.f32 %v512_v56, %v429_v26  ;;  %v472_v6 = vadd.f32 %v471_v0, %v431_v38  ;;  %v367_v41 = vadd.f32 %v366_v53, %v1950_v51  ;;  %v614_v26 = vsub.f32 %v1647_v24, %v1698_v15 }
  0xb2   : > { %v326_v56 = vrot.slane %v325_v4, 4  ;;  %v342_v23 = vadd.f32 %v341_v20, %v1967_v29 }
  0xb3   : > { %v514_v17 = vadd.f32 %v513_v25, %v433_v22  ;;  %v473_v27 = vadd.f32 %v472_v6, %v435_v5  ;;  %v368_v38 = vrot.slane %v367_v41, 4  ;;  %v376_v22 = vmul.f32 %v1806_v1, %v1806_v1 }
  0xb4   : > { %v327_v37 = vadd.f32 %v326_v56, %v325_v4  ;;  %v343_v25 = vadd.f32 %v342_v23, %v1971_v62  ;;  %v678_v54 = vmul.f32 %v614_v26, %v1704_v33  ;;  %v384_v4 = vmul.f32 %v1828_v58, %v1828_v58 }
  0xb5   : > { %717 = vxpose.xlu0.b32.cont [8/16] %v674_v63, 128  ;;  %v515_v0 = vadd.f32 %v514_v17, %v437_v3  ;;  %v474_v12 = vrot.slane %v473_v27, 4  ;;  %v380_v63 = vmul.f32 %v1809_v2, %v1809_v2  ;;  %v369_v24 = vadd.f32 %v368_v38, %v367_v41  ;;  %v1980_v3 = vld [vmem:[%s1592_s17 + $0x1b0] sm:$0xff] }
  0xb6   : > { %v328_v5 = vrot.slane %v327_v37, 2  ;;  %v388_v41 = vmul.f32 %v1842_v13, %v1842_v13  ;;  %v618_v23 = vsub.f32 %v1653_v28, %v1698_v15 }
  0xb7   : > { %v516_v53 = vrot.slane %v515_v0, 4  ;;  %v475_v17 = vadd.f32 %v474_v12, %v473_v27  ;;  %v370_v6 = vrot.slane %v369_v24, 2  ;;  %v480_v38 = vadd.f32 %v380_v63, %v376_v22 }
  0xb8   : > { %v329_v56 = vadd.f32 %v328_v5, %v327_v37  ;;  %v344_v12 = vadd.f32 %v343_v25, %v1980_v3  ;;  %v392_v27 = vmul.f32 %v1859_v34, %v1859_v34  ;;  %v1992_v37 = vld [vmem:[%s1592_s17 + $0x1d0] sm:$0xff]  ;;  %v396_v22 = vmul.f32 %v1877_v55, %v1877_v55 }
  0xb9   : > { %v517_v20 = vadd.f32 %v516_v53, %v515_v0  ;;  %v476_v51 = vrot.slane %v475_v17, 2  ;;  %v371_v26 = vadd.f32 %v370_v6, %v369_v24  ;;  %v481_v53 = vadd.f32 %v480_v38, %v384_v4 }
  0xba   : > { %v330_v57 = vrot.slane %v329_v56, 1  ;;  %v682_v63 = vmul.f32 %v618_v23, %v1704_v33  ;;  %v345_v25 = vadd.f32 %v344_v12, %v1992_v37  ;;  %v622_v23 = vsub.f32 %v1659_v32, %v1698_v15 }
  0xbb   : > { %v477_v8 = vadd.f32 %v476_v51, %v475_v17  ;;  %v518_v0 = vrot.slane %v517_v20, 2  ;;  %v482_v28 = vadd.f32 %v481_v53, %v388_v41  ;;  %v372_v24 = vrot.slane %v371_v26, 1 }
  0xbc   : > { %v331_v5 = vadd.f32 %v330_v57, %v329_v56  ;;  %v404_v41 = vmul.f32 %v1909_v39, %v1909_v39  ;;  %v346_v12 = vadd.f32 %v345_v25, %v2003_v31  ;;  %v416_v32 = vmul.f32 %v1960_v11, %v1960_v11 }
  0xbd   : > { %718 = vxpose.xlu0.b32.cont [9/16] %v678_v54, 128  ;;  %v478_v35 = vrot.slane %v477_v8, 1  ;;  %v400_v54 = vmul.f32 %v1895_v18, %v1895_v18  ;;  %v519_v17 = vadd.f32 %v518_v0, %v517_v20  ;;  %v483_v57 = vadd.f32 %v482_v28, %v392_v27 }
  0xbe   : > { %v2000_v51 = vmul.f32 0.03125, %v331_v5  ;;  %v373_v20 = vadd.f32 %v372_v24, %v371_v26  ;;  %v412_v5 = vmul.f32 %v1944_v16, %v1944_v16  ;;  %v420_v26 = vmul.f32 %v1967_v29, %v1967_v29 }
  0xbf   : > { %v479_v6 = vadd.f32 %v478_v35, %v477_v8  ;;  %v484_v38 = vadd.f32 %v483_v57, %v396_v22  ;;  %v408_v8 = vmul.f32 %v1926_v7, %v1926_v7  ;;  %v520_v27 = vrot.slane %v519_v17, 1 }
  0xc0   : > { %v531_v56 = vmul.f32 %v2000_v51, %v2000_v51  ;;  %v686_v22 = vmul.f32 %v622_v23, %v1704_v33  ;;  %v2019_v57 = vmul.f32 0.03125, %v373_v20 }
  0xc1   : > { %v527_v4 = vmul.f32 0.03125, %v479_v6  ;;  %v485_v0 = vadd.f32 %v484_v38, %v400_v54  ;;  %v347_v6 = vrot.slane %v346_v12, 4  ;;  %v521_v25 = vadd.f32 %v520_v27, %v519_v17 }
  0xc2   : > { %v626_v54 = vsub.f32 %v1665_v36, %v1698_v15 }
  0xc3   : > { %v535_v35 = vsub.f32 %v527_v4, %v531_v56  ;;  %v486_v28 = vadd.f32 %v485_v0, %v404_v41  ;;  %v424_v4 = vmul.f32 %v1971_v62, %v1971_v62  ;;  %v529_v56 = vmul.f32 0.03125, %v521_v25 }
  0xc4   : > { %v533_v41 = vmul.f32 %v2019_v57, %v2019_v57  ;;  %v348_v38 = vadd.f32 %v347_v6, %v346_v12  ;;  %v690_v27 = vmul.f32 %v626_v54, %v1704_v33  ;;  %v630_v12 = vsub.f32 %v1671_v40, %v1698_v15 }
  0xc5   : > { %719 = vxpose.xlu0.b32.cont [10/16] %v682_v63, 128  ;;  %v539_v53 = vadd.f32 1e-05, %v535_v35  ;;  %v487_v63 = vadd.f32 %v486_v28, %v408_v8  ;;  %v428_v8 = vmul.f32 %v1980_v3, %v1980_v3  ;;  %v583_v54 = vsub.f32 %v1719_v42, %v2000_v51 }
  0xc6   : > { %v537_v0 = vsub.f32 %v529_v56, %v533_v41  ;;  %v349_v36 = vrot.slane %v348_v38, 2  ;;  %v694_v41 = vmul.f32 %v630_v12, %v1704_v33  ;;  %v587_v42 = vsub.f32 %v1722_v43, %v2000_v51 }
  0xc7   : > { %1273 = vrsqrt.f32 %v539_v53  ;;  %v488_v24 = vadd.f32 %v487_v63, %v412_v5  ;;  %vm558_vm3 = vweird.f32 %v539_v53 }
  0xc8   : > { %v541_v63 = vadd.f32 1e-05, %v537_v0 }
  0xc9   : > { %v489_v17 = vadd.f32 %v488_v24, %v416_v32  ;;  %v436_v32 = vmul.f32 %v2003_v31, %v2003_v31 }
  0xca   : > { %1275 = vrsqrt.f32 %v541_v63  ;;  %vm578_vm6 = vweird.f32 %v541_v63 }
  0xcb   : > { %v490_v35 = vadd.f32 %v489_v17, %v420_v26  ;;  %v350_v26 = vadd.f32 %v349_v36, %v348_v38  ;;  %v634_v38 = vsub.f32 %v1677_v44, %v1698_v15  ;;  %v638_v44 = vsub.f32 %v1683_v48, %v1698_v15 }
  0xcc   : > { %v642_v48 = vsub.f32 %v1689_v52, %v1698_v15  ;;  %v585_v52 = vsub.f32 %v1725_v45, %v2019_v57  ;;  %v599_v15 = vsub.f32 %v1769_v9, %v2000_v51  ;;  %v589_v9 = vsub.f32 %v1734_v47, %v2019_v57 }
  0xcd   : > { %720 = vxpose.xlu0.b32.cont [11/16] %v686_v22, 128  ;;  %v1274_v23 = vpop.eup %1273  ;;  %v491_v5 = vadd.f32 %v490_v35, %v424_v4  ;;  %v432_v22 = vmul.f32 %v1992_v37, %v1992_v37  ;;  %v351_v40 = vrot.slane %v350_v26, 1  ;;  %v593_v47 = vsub.f32 %v1741_v50, %v2019_v57 }
  0xce   : > { %v553_v20 = vmul.f32 %v1274_v23, %v539_v53  ;;  %vm559_vm4 = vweird.f32 %v1274_v23 }
  0xcf   : > { %v492_v25 = vadd.f32 %v491_v5, %v428_v8  ;;  %vm560_vm5 = vmor %vm558_vm3, %vm559_vm4  ;;  %v698_v5 = vmul.f32 %v634_v38, %v1704_v33 }
  0xd0   : > { %v554_v28 = vmul.f32 %v1274_v23, %v553_v20  ;;  %v352_v20 = vadd.f32 %v351_v40, %v350_v26  ;;  %v1276_v0 = vpop.eup %1275 }
  0xd1   : > { %v493_v4 = vadd.f32 %v492_v25, %v432_v22  ;;  %v573_v25 = vmul.f32 %v1276_v0, %v541_v63  ;;  %vm579_vm7 = vweird.f32 %v1276_v0 }
  0xd2   : > { %v555_v6 = vmul.f32 0.5, %v554_v28  ;;  %v2050_v22 = vmul.f32 0.03125, %v352_v20  ;;  %vm580_vm8 = vmor %vm578_vm6, %vm579_vm7 }
  0xd3   : > { %v494_v17 = vadd.f32 %v493_v4, %v436_v32  ;;  %v591_v32 = vsub.f32 %v1738_v49, %v2000_v51  ;;  %v574_v26 = vmul.f32 %v1276_v0, %v573_v25  ;;  %v706_v49 = vmul.f32 %v642_v48, %v1704_v33  ;;  %v2117_v48 = vld [vmem:[#allocation5] ss:$0 sm:$0xff] }
  0xd4   : > { %v556_v24 = vsub.f32 1.5, %v555_v6  ;;  %v532_v43 = vmul.f32 %v2050_v22, %v2050_v22 }
  0xd5   : > { %721 = vxpose.xlu0.b32.cont [12/16] %v690_v27, 128  ;;  %v495_v53 = vrot.slane %v494_v17, 4 }
  0xd6   : > { %v557_v56 = vmul.f32 %v1274_v23, %v556_v24 }
  0xd7   : > { %v496_v27 = vadd.f32 %v495_v53, %v494_v17  ;;  %v595_v17 = vsub.f32 %v1755_v59, %v2000_v51 }
  0xd8   : > { %v2041_v8 = vsel %vm560_vm5, %v1274_v23, %v557_v56 }
  0xd9   : > { %v647_v35 = vmul.f32 %v583_v54, %v2041_v8  ;;  %v497_v36 = vrot.slane %v496_v27, 2  ;;  %v651_v23 = vmul.f32 %v587_v42, %v2041_v8  ;;  %v702_v54 = vmul.f32 %v638_v44, %v1704_v33 }
  0xda   : > { %v655_v56 = vmul.f32 %v591_v32, %v2041_v8  ;;  %v659_v53 = vmul.f32 %v595_v17, %v2041_v8  ;;  %v603_v44 = vsub.f32 %v1779_v19, %v2000_v51  ;;  %v592_v32 = vsub.f32 %v1828_v58, %v2050_v22  ;;  %v2122_v17 = vld [vmem:[%s2452_s2] ss:$0 sm:$0xff] }
  0xdb   : > { %742 = vxpose.xlu1.b32.start [1/16] %v647_v35, 128  ;;  %v498_v28 = vadd.f32 %v497_v36, %v496_v27  ;;  %v663_v36 = vmul.f32 %v599_v15, %v2041_v8  ;;  %v611_v58 = vsub.f32 %v1814_v46, %v2000_v51  ;;  %v608_v15 = vsub.f32 %v1895_v18, %v2050_v22 }
  0xdd   : > { %722 = vxpose.xlu0.b32.cont [13/16] %v694_v41, 128  ;;  %v499_v12 = vrot.slane %v498_v28, 1  ;;  %v575_v41 = vmul.f32 0.5, %v574_v26  ;;  %v597_v26 = vsub.f32 %v1758_v60, %v2019_v57 }
  0xdf   : > { %v500_v6 = vadd.f32 %v499_v12, %v498_v28  ;;  %v576_v35 = vsub.f32 1.5, %v575_v41  ;;  %v588_v12 = vsub.f32 %v1809_v2, %v2050_v22  ;;  %v607_v2 = vsub.f32 %v1792_v30, %v2000_v51 }
  0xe0   : > { %v675_v30 = vmul.f32 %v611_v58, %v2041_v8  ;;  %v600_v41 = vsub.f32 %v1859_v34, %v2050_v22 }
  0xe1   : > { %v528_v24 = vmul.f32 0.03125, %v500_v6  ;;  %v577_v38 = vmul.f32 %v1276_v0, %v576_v35  ;;  %v671_v19 = vmul.f32 %v607_v2, %v2041_v8  ;;  %v604_v35 = vsub.f32 %v1877_v55, %v2050_v22 }
  0xe3   : > { %743 = vxpose.xlu1.b32.cont [2/16] %v651_v23, 128  ;;  %v536_v4 = vsub.f32 %v528_v24, %v532_v43  ;;  %v2070_v59 = vsel %vm580_vm8, %v1276_v0, %v577_v38  ;;  %v584_v23 = vsub.f32 %v1806_v1, %v2050_v22  ;;  %v667_v1 = vmul.f32 %v603_v44, %v2041_v8 }
  0xe4   : > { %v649_v33 = vmul.f32 %v585_v52, %v2070_v59  ;;  %v653_v25 = vmul.f32 %v589_v9, %v2070_v59  ;;  %v657_v43 = vmul.f32 %v593_v47, %v2070_v59  ;;  %v661_v24 = vmul.f32 %v597_v26, %v2070_v59 }
  0xe5   : > { %723 = vxpose.xlu0.b32.cont [14/16] %v698_v5, 128  ;;  %v540_v40 = vadd.f32 1e-05, %v536_v4  ;;  %v601_v4 = vsub.f32 %v1772_v10, %v2019_v57  ;;  %v616_v26 = vsub.f32 %v1926_v7, %v2050_v22 }
  0xe7   : > { %1277 = vrsqrt.f32 %v540_v40  ;;  %vm568_vm9 = vweird.f32 %v540_v40 }
  0xeb   : > { %744 = vxpose.xlu1.b32.cont [3/16] %v655_v56, 128  ;;  %v665_v56 = vmul.f32 %v601_v4, %v2070_v59  ;;  %v2518_v4 = vld [vmem:[#allocation20_spill] sm:$0xff] }
  0xed   : > { %724 = vxpose.xlu0.b32.cont [15/16] %v702_v54, 128  ;;  %v1278_v42 = vpop.eup %1277  ;;  %v596_v54 = vsub.f32 %v1842_v13, %v2050_v22  ;;  %v615_v13 = vsub.f32 %v1831_v61, %v2000_v51 }
  0xee   : > { %v563_v20 = vmul.f32 %v1278_v42, %v540_v40  ;;  %vm569_vm10 = vweird.f32 %v1278_v42  ;;  %v605_v40 = vsub.f32 %v1782_v21, %v2019_v57  ;;  %v619_v21 = vsub.f32 %v1845_v14, %v2000_v51 }
  0xef   : > { %vm570_vm11 = vmor %vm568_vm9, %vm569_vm10  ;;  %v679_v46 = vmul.f32 %v615_v13, %v2041_v8  ;;  %v620_v13 = vsub.f32 %v1944_v16, %v2050_v22 }
  0xf0   : > { %v564_v63 = vmul.f32 %v1278_v42, %v563_v20  ;;  %v669_v61 = vmul.f32 %v605_v40, %v2070_v59 }
  0xf2   : > { %v565_v27 = vmul.f32 0.5, %v564_v63  ;;  %v2513_v63 = vld [vmem:[#allocation21_spill] sm:$0xff] }
  0xf3   : > { %745 = vxpose.xlu1.b32.cont [4/16] %v659_v53, 128  ;;  %v683_v53 = vmul.f32 %v619_v21, %v2041_v8 }
  0xf4   : > { %v566_v5 = vsub.f32 1.5, %v565_v27  ;;  %v623_v27 = vsub.f32 %v2513_v63, %v2000_v51 }
  0xf5   : > { %725 = vxpose.xlu0.b32.end [16/16] %v706_v49, 128 }
  0xf6   : > { %v567_v45 = vmul.f32 %v1278_v42, %v566_v5 }
  0xf8   : > { %v2078_v0 = vsel %vm570_vm11, %v1278_v42, %v567_v45  ;;  %v2512_v42 = vld [vmem:[#allocation17_spill] sm:$0xff] }
  0xf9   : > { %v648_v28 = vmul.f32 %v584_v23, %v2078_v0  ;;  %v652_v6 = vmul.f32 %v588_v12, %v2078_v0  ;;  %v656_v50 = vmul.f32 %v592_v32, %v2078_v0  ;;  %v660_v60 = vmul.f32 %v596_v54, %v2078_v0  ;;  %v2514_v23 = vld [vmem:[#allocation18_spill] sm:$0xff]  ;;  %v2515_v12 = vld [vmem:[#allocation23_spill] sm:$0xff] }
  0xfa   : > { %v664_v10 = vmul.f32 %v600_v41, %v2078_v0  ;;  %v609_v20 = vsub.f32 %v2512_v42, %v2019_v57  ;;  %v668_v52 = vmul.f32 %v604_v35, %v2078_v0  ;;  %v613_v45 = vsub.f32 %v2514_v23, %v2019_v57  ;;  %v2520_v35 = vld [vmem:[#allocation22_spill] sm:$0xff]  ;;  %v2521_v42 = vld [vmem:[#allocation29_spill] sm:$0xff] }
  0xfb   : > { %746 = vxpose.xlu1.b32.cont [5/16] %v663_v36, 128  ;;  %774 = vxpose.xlu2.b32.start [1/16] %v648_v28, 128  ;;  %v687_v36 = vmul.f32 %v623_v27, %v2041_v8  ;;  %v672_v9 = vmul.f32 %v608_v15, %v2078_v0  ;;  %v627_v44 = vsub.f32 %v2515_v12, %v2000_v51  ;;  %v2522_v15 = vld [vmem:[#allocation24_spill] sm:$0xff] }
  0xfc   : > { %v673_v55 = vmul.f32 %v609_v20, %v2070_v59  ;;  %v677_v18 = vmul.f32 %v613_v45, %v2070_v59  ;;  %v625_v21 = vsub.f32 %v2520_v35, %v2019_v57  ;;  %v639_v20 = vsub.f32 %v2521_v42, %v2000_v51 }
  0xfd   : > { %806 = vxpose.xlu0.b32.start [1/16] %v649_v33, 128  ;;  %v691_v47 = vmul.f32 %v627_v44, %v2041_v8  ;;  %v629_v63 = vsub.f32 %v2522_v15, %v2019_v57 }
  0xfe   : > { %v689_v16 = vmul.f32 %v625_v21, %v2070_v59 }
 0x103   : > { %747 = vxpose.xlu1.b32.cont [6/16] %v667_v1, 128  ;;  %775 = vxpose.xlu2.b32.cont [2/16] %v652_v6, 128 }
 0x105   : > { %807 = vxpose.xlu0.b32.cont [2/16] %v653_v25, 128  ;;  %v612_v25 = vsub.f32 %v1909_v39, %v2050_v22 }
 0x107   : > { %v676_v2 = vmul.f32 %v612_v25, %v2078_v0 }
 0x10b   : > { %748 = vxpose.xlu1.b32.cont [7/16] %v671_v19, 128  ;;  %776 = vxpose.xlu2.b32.cont [3/16] %v656_v50, 128  ;;  %v2517_v50 = vld [vmem:[#allocation25_spill] sm:$0xff] }
 0x10d   : > { %808 = vxpose.xlu0.b32.cont [3/16] %v657_v43, 128  ;;  %v2516_v43 = vld [vmem:[#allocation19_spill] sm:$0xff] }
 0x10e   : > { %v617_v32 = vsub.f32 %v2516_v43, %v2019_v57 }
 0x110   : > { %v681_v39 = vmul.f32 %v617_v32, %v2070_v59 }
 0x113   : > { %749 = vxpose.xlu1.b32.cont [8/16] %v675_v30, 128  ;;  %777 = vxpose.xlu2.b32.cont [4/16] %v660_v60, 128  ;;  %v621_v60 = vsub.f32 %v2518_v4, %v2019_v57 }
 0x115   : > { %809 = vxpose.xlu0.b32.cont [4/16] %v661_v24, 128  ;;  %v631_v24 = vsub.f32 %v2517_v50, %v2000_v51  ;;  %v685_v7 = vmul.f32 %v621_v60, %v2070_v59  ;;  %v2527_v60 = vld [vmem:[#allocation32_spill] sm:$0xff] }
 0x117   : > { %v695_v58 = vmul.f32 %v631_v24, %v2041_v8 }
 0x11b   : > { %750 = vxpose.xlu1.b32.cont [9/16] %v679_v46, 128  ;;  %778 = vxpose.xlu2.b32.cont [5/16] %v664_v10, 128  ;;  %v2519_v46 = vld [vmem:[#allocation27_spill] sm:$0xff] }
 0x11c   : > { %v635_v40 = vsub.f32 %v2519_v46, %v2000_v51  ;;  %v644_v46 = vsub.f32 %v2003_v31, %v2050_v22 }
 0x11d   : > { %810 = vxpose.xlu0.b32.cont [5/16] %v665_v56, 128  ;;  %v680_v56 = vmul.f32 %v616_v26, %v2078_v0  ;;  %v2526_v26 = vld [vmem:[#allocation30_spill] sm:$0xff] }
 0x11e   : > { %v641_v50 = vsub.f32 %v2526_v26, %v2019_v57 }
 0x121   : > { %v726_v34 = vpop.trf.xlu0 }
 0x122   : > { %v843_v49 = vmul.f32 %v2117_v48, %v726_v34  ;;  %v699_v34 = vmul.f32 %v635_v40, %v2041_v8 }
 0x123   : > { %751 = vxpose.xlu1.b32.cont [10/16] %v683_v53, 128  ;;  %779 = vxpose.xlu2.b32.cont [6/16] %v668_v52, 128 }
 0x124   : > { %v910_v38 = vadd.f32 %v2122_v17, %v843_v49  ;;  %v684_v49 = vmul.f32 %v620_v13, %v2078_v0 }
 0x125   : > { %811 = vxpose.xlu0.b32.cont [6/16] %v669_v61, 128 }
 0x126   : > { %974 = vst [vmem:[%s2137_s25] sm:$0xff] %v910_v38  ;;  %v624_v38 = vsub.f32 %v1960_v11, %v2050_v22  ;;  %v693_v11 = vmul.f32 %v629_v63, %v2070_v59 }
 0x128   : > { %v688_v27 = vmul.f32 %v624_v38, %v2078_v0 }
 0x129   : > { %v727_v14 = vpop.trf.xlu0 }
 0x12a   : > { %v844_v33 = vmul.f32 %v2117_v48, %v727_v14  ;;  %v703_v14 = vmul.f32 %v639_v20, %v2041_v8 }
 0x12b   : > { %752 = vxpose.xlu1.b32.cont [11/16] %v687_v36, 128  ;;  %780 = vxpose.xlu2.b32.cont [7/16] %v672_v9, 128  ;;  %v628_v36 = vsub.f32 %v1967_v29, %v2050_v22 }
 0x12c   : > { %v911_v5 = vadd.f32 %v2122_v17, %v844_v33 }
 0x12d   : > { %812 = vxpose.xlu0.b32.cont [7/16] %v673_v55, 128  ;;  %v692_v12 = vmul.f32 %v628_v36, %v2078_v0 }
 0x12e   : > { %975 = vst [vmem:[%s2137_s25 + $0x8] sm:$0xff] %v911_v5  ;;  %v2523_v5 = vld [vmem:[#allocation31_spill] sm:$0xff] }
 0x12f   : > { %v643_v23 = vsub.f32 %v2523_v5, %v2000_v51  ;;  %v632_v51 = vsub.f32 %v1971_v62, %v2050_v22 }
 0x131   : > { %v728_v28 = vpop.trf.xlu0  ;;  %v707_v9 = vmul.f32 %v643_v23, %v2041_v8  ;;  %v696_v43 = vmul.f32 %v632_v51, %v2078_v0 }
 0x132   : > { %v845_v1 = vmul.f32 %v2117_v48, %v728_v28 }
 0x133   : > { %753 = vxpose.xlu1.b32.cont [12/16] %v691_v47, 128  ;;  %781 = vxpose.xlu2.b32.cont [8/16] %v676_v2, 128  ;;  %v2525_v47 = vld [vmem:[#allocation28_spill] sm:$0xff] }
 0x134   : > { %v912_v6 = vadd.f32 %v2122_v17, %v845_v1 }
 0x135   : > { %813 = vxpose.xlu0.b32.cont [8/16] %v677_v18, 128  ;;  %v2524_v18 = vld [vmem:[#allocation26_spill] sm:$0xff] }
 0x136   : > { %976 = vst [vmem:[%s2137_s25 + $0x10] sm:$0xff] %v912_v6  ;;  %v633_v25 = vsub.f32 %v2524_v18, %v2019_v57  ;;  %v637_v6 = vsub.f32 %v2525_v47, %v2019_v57 }
 0x138   : > { %v697_v29 = vmul.f32 %v633_v25, %v2070_v59  ;;  %v701_v2 = vmul.f32 %v637_v6, %v2070_v59 }
 0x139   : > { %v729_v19 = vpop.trf.xlu0 }
 0x13a   : > { %v846_v54 = vmul.f32 %v2117_v48, %v729_v19  ;;  %v636_v19 = vsub.f32 %v1980_v3, %v2050_v22  ;;  %v640_v3 = vsub.f32 %v1992_v37, %v2050_v22 }
 0x13b   : > { %754 = vxpose.xlu1.b32.cont [13/16] %v695_v58, 128  ;;  %782 = vxpose.xlu2.b32.cont [9/16] %v680_v56, 128  ;;  %v705_v58 = vmul.f32 %v641_v50, %v2070_v59  ;;  %v645_v56 = vsub.f32 %v2527_v60, %v2019_v57  ;;  %v708_v57 = vmul.f32 %v644_v46, %v2078_v0 }
 0x13c   : > { %v913_v30 = vadd.f32 %v2122_v17, %v846_v54  ;;  %v700_v24 = vmul.f32 %v636_v19, %v2078_v0 }
 0x13d   : > { %814 = vxpose.xlu0.b32.cont [9/16] %v681_v39, 128  ;;  %v709_v13 = vmul.f32 %v645_v56, %v2070_v59 }
 0x13e   : > { %977 = vst [vmem:[%s2137_s25 + $0x18] sm:$0xff] %v913_v30 }
 0x141   : > { %v730_v41 = vpop.trf.xlu0 }
 0x142   : > { %v847_v10 = vmul.f32 %v2117_v48, %v730_v41  ;;  %v704_v41 = vmul.f32 %v640_v3, %v2078_v0 }
 0x143   : > { %755 = vxpose.xlu1.b32.cont [14/16] %v699_v34, 128  ;;  %783 = vxpose.xlu2.b32.cont [10/16] %v684_v49, 128 }
 0x144   : > { %v914_v61 = vadd.f32 %v2122_v17, %v847_v10 }
 0x145   : > { %815 = vxpose.xlu0.b32.cont [10/16] %v685_v7, 128 }
 0x146   : > { %978 = vst [vmem:[%s2137_s25 + $0x20] sm:$0xff] %v914_v61 }
 0x149   : > { %v731_v53 = vpop.trf.xlu0 }
 0x14a   : > { %v848_v52 = vmul.f32 %v2117_v48, %v731_v53 }
 0x14b   : > { %756 = vxpose.xlu1.b32.cont [15/16] %v703_v14, 128  ;;  %784 = vxpose.xlu2.b32.cont [11/16] %v688_v27, 128 }
 0x14c   : > { %v915_v55 = vadd.f32 %v2122_v17, %v848_v52 }
 0x14d   : > { %816 = vxpose.xlu0.b32.cont [11/16] %v689_v16, 128 }
 0x14e   : > { %979 = vst [vmem:[%s2137_s25 + $0x28] sm:$0xff] %v915_v55 }
 0x151   : > { %v732_v33 = vpop.trf.xlu0 }
 0x152   : > { %v849_v45 = vmul.f32 %v2117_v48, %v732_v33 }
 0x153   : > { %757 = vxpose.xlu1.b32.end [16/16] %v707_v9, 128  ;;  %785 = vxpose.xlu2.b32.cont [12/16] %v692_v12, 128 }
 0x154   : > { %v916_v28 = vadd.f32 %v2122_v17, %v849_v45 }
 0x155   : > { %817 = vxpose.xlu0.b32.cont [12/16] %v693_v11, 128 }
 0x156   : > { %980 = vst [vmem:[%s2137_s25 + $0x30] sm:$0xff] %v916_v28 }
 0x159   : > { %v733_v44 = vpop.trf.xlu0 }
 0x15a   : > { %v850_v8 = vmul.f32 %v2117_v48, %v733_v44 }
 0x15b   : > { %786 = vxpose.xlu2.b32.cont [13/16] %v696_v43, 128 }
 0x15c   : > { %v917_v1 = vadd.f32 %v2122_v17, %v850_v8 }
 0x15d   : > { %818 = vxpose.xlu0.b32.cont [13/16] %v697_v29, 128 }
 0x15e   : > { %981 = vst [vmem:[%s2137_s25 + $0x38] sm:$0xff] %v917_v1 }
 0x161   : > { %v734_v32 = vpop.trf.xlu0 }
 0x162   : > { %v851_v62 = vmul.f32 %v2117_v48, %v734_v32 }
 0x163   : > { %787 = vxpose.xlu2.b32.cont [14/16] %v700_v24, 128 }
 0x164   : > { %v918_v39 = vadd.f32 %v2122_v17, %v851_v62 }
 0x165   : > { %819 = vxpose.xlu0.b32.cont [14/16] %v701_v2, 128 }
 0x166   : > { %982 = vst [vmem:[%s2137_s25 + $0x40] sm:$0xff] %v918_v39 }
 0x169   : > { %v735_v54 = vpop.trf.xlu0 }
 0x16a   : > { %v852_v30 = vmul.f32 %v2117_v48, %v735_v54 }
 0x16b   : > { %788 = vxpose.xlu2.b32.cont [15/16] %v704_v41, 128 }
 0x16c   : > { %v919_v4 = vadd.f32 %v2122_v17, %v852_v30 }
 0x16d   : > { %820 = vxpose.xlu0.b32.cont [15/16] %v705_v58, 128 }
 0x16e   : > { %983 = vst [vmem:[%s2137_s25 + $0x48] sm:$0xff] %v919_v4 }
 0x171   : > { %v736_v7 = vpop.trf.xlu0 }
 0x172   : > { %v853_v37 = vmul.f32 %v2117_v48, %v736_v7 }
 0x173   : > { %789 = vxpose.xlu2.b32.end [16/16] %v708_v57, 128 }
 0x174   : > { %v920_v40 = vadd.f32 %v2122_v17, %v853_v37 }
 0x175   : > { %821 = vxpose.xlu0.b32.end [16/16] %v709_v13, 128 }
 0x176   : > { %984 = vst [vmem:[%s2137_s25 + $0x50] sm:$0xff] %v920_v40 }
 0x179   : > { %v737_v10 = vpop.trf.xlu0 }
 0x17a   : > { %v854_v34 = vmul.f32 %v2117_v48, %v737_v10 }
 0x17c   : > { %v921_v59 = vadd.f32 %v2122_v17, %v854_v34 }
 0x17e   : > { %985 = vst [vmem:[%s2137_s25 + $0x58] sm:$0xff] %v921_v59 }
 0x17f   : > { %v758_v22 = vpop.trf.xlu1 }
 0x180   : > { %v859_v35 = vmul.f32 %v2117_v48, %v758_v22 }
 0x181   : > { %v738_v31 = vpop.trf.xlu0 }
 0x182   : > { %v855_v61 = vmul.f32 %v2117_v48, %v738_v31  ;;  %v926_v0 = vadd.f32 %v2122_v17, %v859_v35 }
 0x184   : > { %v922_v21 = vadd.f32 %v2122_v17, %v855_v61  ;;  %990 = vst [vmem:[%s2137_s25 + $0x80] sm:$0xff] %v926_v0 }
 0x186   : > { %986 = vst [vmem:[%s2137_s25 + $0x60] sm:$0xff] %v922_v21 }
 0x187   : > { %v759_v53 = vpop.trf.xlu1 }
 0x188   : > { %v860_v38 = vmul.f32 %v2117_v48, %v759_v53 }
 0x189   : > { %v739_v49 = vpop.trf.xlu0 }
 0x18a   : > { %v856_v16 = vmul.f32 %v2117_v48, %v739_v49  ;;  %v927_v20 = vadd.f32 %v2122_v17, %v860_v38 }
 0x18c   : > { %v923_v42 = vadd.f32 %v2122_v17, %v856_v16  ;;  %991 = vst [vmem:[%s2137_s25 + $0x88] sm:$0xff] %v927_v20 }
 0x18e   : > { %987 = vst [vmem:[%s2137_s25 + $0x68] sm:$0xff] %v923_v42 }
 0x18f   : > { %v760_v14 = vpop.trf.xlu1 }
 0x190   : > { %v861_v15 = vmul.f32 %v2117_v48, %v760_v14 }
 0x191   : > { %v740_v52 = vpop.trf.xlu0 }
 0x192   : > { %v857_v55 = vmul.f32 %v2117_v48, %v740_v52  ;;  %v928_v27 = vadd.f32 %v2122_v17, %v861_v15 }
 0x194   : > { %v924_v63 = vadd.f32 %v2122_v17, %v857_v55  ;;  %992 = vst [vmem:[%s2137_s25 + $0x90] sm:$0xff] %v928_v27  ;;  %v790_v5 = vpop.trf.xlu2 }
 0x195   : > { %v875_v45 = vmul.f32 %v2117_v48, %v790_v5 }
 0x196   : > { %988 = vst [vmem:[%s2137_s25 + $0x70] sm:$0xff] %v924_v63 }
 0x197   : > { %v761_v11 = vpop.trf.xlu1  ;;  %v942_v18 = vadd.f32 %v2122_v17, %v875_v45 }
 0x198   : > { %v862_v23 = vmul.f32 %v2117_v48, %v761_v11 }
 0x199   : > { %v741_v33 = vpop.trf.xlu0  ;;  %1006 = vst [vmem:[%s2137_s25 + $0x100] sm:$0xff] %v942_v18 }
 0x19a   : > { %v858_v36 = vmul.f32 %v2117_v48, %v741_v33  ;;  %v929_v28 = vadd.f32 %v2122_v17, %v862_v23 }
 0x19c   : > { %v925_v9 = vadd.f32 %v2122_v17, %v858_v36  ;;  %993 = vst [vmem:[%s2137_s25 + $0x98] sm:$0xff] %v929_v28  ;;  %v791_v29 = vpop.trf.xlu2 }
 0x19d   : > { %v876_v8 = vmul.f32 %v2117_v48, %v791_v29 }
 0x19e   : > { %989 = vst [vmem:[%s2137_s25 + $0x78] sm:$0xff] %v925_v9 }
 0x19f   : > { %v762_v12 = vpop.trf.xlu1  ;;  %v943_v6 = vadd.f32 %v2122_v17, %v876_v8 }
 0x1a0   : > { %v863_v51 = vmul.f32 %v2117_v48, %v762_v12 }
 0x1a1   : > { %v822_v25 = vpop.trf.xlu0  ;;  %1007 = vst [vmem:[%s2137_s25 + $0x108] sm:$0xff] %v943_v6 }
 0x1a2   : > { %v891_v44 = vmul.f32 %v2117_v48, %v822_v25  ;;  %v930_v47 = vadd.f32 %v2122_v17, %v863_v51 }
 0x1a4   : > { %v958_v1 = vadd.f32 %v2122_v17, %v891_v44  ;;  %994 = vst [vmem:[%s2137_s25 + $0xa0] sm:$0xff] %v930_v47  ;;  %v792_v19 = vpop.trf.xlu2 }
 0x1a5   : > { %v877_v39 = vmul.f32 %v2117_v48, %v792_v19 }
 0x1a6   : > { %1022 = vst [vmem:[%s2137_s25 + $0x180] sm:$0xff] %v958_v1 }
 0x1a7   : > { %v763_v32 = vpop.trf.xlu1  ;;  %v944_v24 = vadd.f32 %v2122_v17, %v877_v39 }
 0x1a8   : > { %v864_v62 = vmul.f32 %v2117_v48, %v763_v32 }
 0x1a9   : > { %v823_v43 = vpop.trf.xlu0  ;;  %1008 = vst [vmem:[%s2137_s25 + $0x110] sm:$0xff] %v944_v24 }
 0x1aa   : > { %v892_v2 = vmul.f32 %v2117_v48, %v823_v43  ;;  %v931_v50 = vadd.f32 %v2122_v17, %v864_v62 }
 0x1ac   : > { %v959_v26 = vadd.f32 %v2122_v17, %v892_v2  ;;  %995 = vst [vmem:[%s2137_s25 + $0xa8] sm:$0xff] %v931_v50  ;;  %v793_v30 = vpop.trf.xlu2 }
 0x1ad   : > { %v878_v60 = vmul.f32 %v2117_v48, %v793_v30 }
 0x1ae   : > { %1023 = vst [vmem:[%s2137_s25 + $0x188] sm:$0xff] %v959_v26 }
 0x1af   : > { %v764_v58 = vpop.trf.xlu1  ;;  %v945_v7 = vadd.f32 %v2122_v17, %v878_v60 }
 0x1b0   : > { %v865_v4 = vmul.f32 %v2117_v48, %v764_v58 }
 0x1b1   : > { %v824_v54 = vpop.trf.xlu0  ;;  %1009 = vst [vmem:[%s2137_s25 + $0x118] sm:$0xff] %v945_v7 }
 0x1b2   : > { %v893_v3 = vmul.f32 %v2117_v48, %v824_v54  ;;  %v932_v41 = vadd.f32 %v2122_v17, %v865_v4 }
 0x1b4   : > { %v960_v56 = vadd.f32 %v2122_v17, %v893_v3  ;;  %996 = vst [vmem:[%s2137_s25 + $0xb0] sm:$0xff] %v932_v41  ;;  %v794_v40 = vpop.trf.xlu2 }
 0x1b5   : > { %v879_v10 = vmul.f32 %v2117_v48, %v794_v40 }
 0x1b6   : > { %1024 = vst [vmem:[%s2137_s25 + $0x190] sm:$0xff] %v960_v56 }
 0x1b7   : > { %v765_v46 = vpop.trf.xlu1  ;;  %v946_v31 = vadd.f32 %v2122_v17, %v879_v10 }
 0x1b8   : > { %v866_v57 = vmul.f32 %v2117_v48, %v765_v46 }
 0x1b9   : > { %v825_v13 = vpop.trf.xlu0  ;;  %1010 = vst [vmem:[%s2137_s25 + $0x120] sm:$0xff] %v946_v31 }
 0x1ba   : > { %v894_v37 = vmul.f32 %v2117_v48, %v825_v13  ;;  %v933_v59 = vadd.f32 %v2122_v17, %v866_v57 }
 0x1bc   : > { %v961_v34 = vadd.f32 %v2122_v17, %v894_v37  ;;  %997 = vst [vmem:[%s2137_s25 + $0xb8] sm:$0xff] %v933_v59  ;;  %v795_v21 = vpop.trf.xlu2 }
 0x1bd   : > { %v880_v49 = vmul.f32 %v2117_v48, %v795_v21 }
 0x1be   : > { %1025 = vst [vmem:[%s2137_s25 + $0x198] sm:$0xff] %v961_v34 }
 0x1bf   : > { %v766_v61 = vpop.trf.xlu1  ;;  %v947_v38 = vadd.f32 %v2122_v17, %v880_v49 }
 0x1c0   : > { %v867_v0 = vmul.f32 %v2117_v48, %v766_v61 }
 0x1c1   : > { %v826_v22 = vpop.trf.xlu0  ;;  %1011 = vst [vmem:[%s2137_s25 + $0x128] sm:$0xff] %v947_v38 }
 0x1c2   : > { %v895_v35 = vmul.f32 %v2117_v48, %v826_v22  ;;  %v934_v16 = vadd.f32 %v2122_v17, %v867_v0 }
 0x1c4   : > { %v962_v53 = vadd.f32 %v2122_v17, %v895_v35  ;;  %998 = vst [vmem:[%s2137_s25 + $0xc0] sm:$0xff] %v934_v16  ;;  %v796_v14 = vpop.trf.xlu2 }
 0x1c5   : > { %v881_v15 = vmul.f32 %v2117_v48, %v796_v14 }
 0x1c6   : > { %1026 = vst [vmem:[%s2137_s25 + $0x1a0] sm:$0xff] %v962_v53 }
 0x1c7   : > { %v767_v20 = vpop.trf.xlu1  ;;  %v948_v33 = vadd.f32 %v2122_v17, %v881_v15 }
 0x1c8   : > { %v868_v55 = vmul.f32 %v2117_v48, %v767_v20 }
 0x1c9   : > { %v827_v42 = vpop.trf.xlu0  ;;  %1012 = vst [vmem:[%s2137_s25 + $0x130] sm:$0xff] %v948_v33 }
 0x1ca   : > { %v896_v52 = vmul.f32 %v2117_v48, %v827_v42  ;;  %v935_v27 = vadd.f32 %v2122_v17, %v868_v55 }
 0x1cc   : > { %v963_v63 = vadd.f32 %v2122_v17, %v896_v52  ;;  %999 = vst [vmem:[%s2137_s25 + $0xc8] sm:$0xff] %v935_v27  ;;  %v797_v23 = vpop.trf.xlu2 }
 0x1cd   : > { %v882_v9 = vmul.f32 %v2117_v48, %v797_v23 }
 0x1ce   : > { %1027 = vst [vmem:[%s2137_s25 + $0x1a8] sm:$0xff] %v963_v63 }
 0x1cf   : > { %v768_v36 = vpop.trf.xlu1  ;;  %v949_v25 = vadd.f32 %v2122_v17, %v882_v9 }
 0x1d0   : > { %v869_v45 = vmul.f32 %v2117_v48, %v768_v36 }
 0x1d1   : > { %v828_v11 = vpop.trf.xlu0  ;;  %1013 = vst [vmem:[%s2137_s25 + $0x138] sm:$0xff] %v949_v25 }
 0x1d2   : > { %v897_v5 = vmul.f32 %v2117_v48, %v828_v11  ;;  %v936_v18 = vadd.f32 %v2122_v17, %v869_v45 }
 0x1d4   : > { %v964_v28 = vadd.f32 %v2122_v17, %v897_v5  ;;  %1000 = vst [vmem:[%s2137_s25 + $0xd0] sm:$0xff] %v936_v18  ;;  %v798_v51 = vpop.trf.xlu2 }
 0x1d5   : > { %v883_v1 = vmul.f32 %v2117_v48, %v798_v51 }
 0x1d6   : > { %1028 = vst [vmem:[%s2137_s25 + $0x1b0] sm:$0xff] %v964_v28 }
 0x1d7   : > { %v769_v44 = vpop.trf.xlu1  ;;  %v950_v43 = vadd.f32 %v2122_v17, %v883_v1 }
 0x1d8   : > { %v870_v8 = vmul.f32 %v2117_v48, %v769_v44 }
 0x1d9   : > { %v829_v12 = vpop.trf.xlu0  ;;  %1014 = vst [vmem:[%s2137_s25 + $0x140] sm:$0xff] %v950_v43 }
 0x1da   : > { %v898_v29 = vmul.f32 %v2117_v48, %v829_v12  ;;  %v937_v6 = vadd.f32 %v2122_v17, %v870_v8 }
 0x1dc   : > { %v965_v47 = vadd.f32 %v2122_v17, %v898_v29  ;;  %1001 = vst [vmem:[%s2137_s25 + $0xd8] sm:$0xff] %v937_v6  ;;  %v799_v62 = vpop.trf.xlu2 }
 0x1dd   : > { %v884_v26 = vmul.f32 %v2117_v48, %v799_v62 }
 0x1de   : > { %1029 = vst [vmem:[%s2137_s25 + $0x1b8] sm:$0xff] %v965_v47 }
 0x1df   : > { %v770_v2 = vpop.trf.xlu1  ;;  %v951_v54 = vadd.f32 %v2122_v17, %v884_v26 }
 0x1e0   : > { %v871_v39 = vmul.f32 %v2117_v48, %v770_v2 }
 0x1e1   : > { %v830_v32 = vpop.trf.xlu0  ;;  %1015 = vst [vmem:[%s2137_s25 + $0x148] sm:$0xff] %v951_v54 }
 0x1e2   : > { %v899_v19 = vmul.f32 %v2117_v48, %v830_v32  ;;  %v938_v24 = vadd.f32 %v2122_v17, %v871_v39 }
 0x1e4   : > { %v966_v50 = vadd.f32 %v2122_v17, %v899_v19  ;;  %1002 = vst [vmem:[%s2137_s25 + $0xe0] sm:$0xff] %v938_v24  ;;  %v800_v4 = vpop.trf.xlu2 }
 0x1e5   : > { %v885_v56 = vmul.f32 %v2117_v48, %v800_v4 }
 0x1e6   : > { %1030 = vst [vmem:[%s2137_s25 + $0x1c0] sm:$0xff] %v966_v50 }
 0x1e7   : > { %v771_v3 = vpop.trf.xlu1  ;;  %v952_v13 = vadd.f32 %v2122_v17, %v885_v56 }
 0x1e8   : > { %v872_v60 = vmul.f32 %v2117_v48, %v771_v3 }
 0x1e9   : > { %v831_v58 = vpop.trf.xlu0  ;;  %1016 = vst [vmem:[%s2137_s25 + $0x150] sm:$0xff] %v952_v13 }
 0x1ea   : > { %v900_v30 = vmul.f32 %v2117_v48, %v831_v58  ;;  %v939_v7 = vadd.f32 %v2122_v17, %v872_v60 }
 0x1ec   : > { %v967_v41 = vadd.f32 %v2122_v17, %v900_v30  ;;  %1003 = vst [vmem:[%s2137_s25 + $0xe8] sm:$0xff] %v939_v7  ;;  %v801_v57 = vpop.trf.xlu2 }
 0x1ed   : > { %v886_v34 = vmul.f32 %v2117_v48, %v801_v57 }
 0x1ee   : > { %1031 = vst [vmem:[%s2137_s25 + $0x1c8] sm:$0xff] %v967_v41 }
 0x1ef   : > { %v772_v37 = vpop.trf.xlu1  ;;  %v953_v22 = vadd.f32 %v2122_v17, %v886_v34 }
 0x1f0   : > { %v873_v10 = vmul.f32 %v2117_v48, %v772_v37 }
 0x1f1   : > { %v832_v46 = vpop.trf.xlu0  ;;  %1017 = vst [vmem:[%s2137_s25 + $0x158] sm:$0xff] %v953_v22 }
 0x1f2   : > { %v901_v40 = vmul.f32 %v2117_v48, %v832_v46  ;;  %v940_v31 = vadd.f32 %v2122_v17, %v873_v10 }
 0x1f4   : > { %v968_v59 = vadd.f32 %v2122_v17, %v901_v40  ;;  %1004 = vst [vmem:[%s2137_s25 + $0xf0] sm:$0xff] %v940_v31  ;;  %v802_v0 = vpop.trf.xlu2 }
 0x1f5   : > { %v887_v53 = vmul.f32 %v2117_v48, %v802_v0 }
 0x1f6   : > { %1032 = vst [vmem:[%s2137_s25 + $0x1d0] sm:$0xff] %v968_v59 }
 0x1f7   : > { %v773_v35 = vpop.trf.xlu1  ;;  %v954_v42 = vadd.f32 %v2122_v17, %v887_v53 }
 0x1f8   : > { %v874_v49 = vmul.f32 %v2117_v48, %v773_v35 }
 0x1f9   : > { %v833_v61 = vpop.trf.xlu0  ;;  %1018 = vst [vmem:[%s2137_s25 + $0x160] sm:$0xff] %v954_v42 }
 0x1fa   : > { %v902_v21 = vmul.f32 %v2117_v48, %v833_v61  ;;  %v941_v38 = vadd.f32 %v2122_v17, %v874_v49 }
 0x1fc   : > { %v969_v16 = vadd.f32 %v2122_v17, %v902_v21  ;;  %1005 = vst [vmem:[%s2137_s25 + $0xf8] sm:$0xff] %v941_v38  ;;  %v803_v14 = vpop.trf.xlu2 }
 0x1fd   : > { %v888_v55 = vmul.f32 %v2117_v48, %v803_v14 }
 0x1fe   : > { %1033 = vst [vmem:[%s2137_s25 + $0x1d8] sm:$0xff] %v969_v16 }
 0x1ff   : > { %v955_v63 = vadd.f32 %v2122_v17, %v888_v55 }
 0x201   : > { %v834_v20 = vpop.trf.xlu0  ;;  %1019 = vst [vmem:[%s2137_s25 + $0x168] sm:$0xff] %v955_v63 }
 0x202   : > { %v903_v52 = vmul.f32 %v2117_v48, %v834_v20 }
 0x204   : > { %v970_v15 = vadd.f32 %v2122_v17, %v903_v52  ;;  %v804_v11 = vpop.trf.xlu2 }
 0x205   : > { %v889_v36 = vmul.f32 %v2117_v48, %v804_v11 }
 0x206   : > { %1034 = vst [vmem:[%s2137_s25 + $0x1e0] sm:$0xff] %v970_v15 }
 0x207   : > { %v956_v23 = vadd.f32 %v2122_v17, %v889_v36 }
 0x209   : > { %v835_v27 = vpop.trf.xlu0  ;;  %1020 = vst [vmem:[%s2137_s25 + $0x170] sm:$0xff] %v956_v23 }
 0x20a   : > { %v904_v33 = vmul.f32 %v2117_v48, %v835_v27 }
 0x20c   : > { %v971_v5 = vadd.f32 %v2122_v17, %v904_v33  ;;  %v805_v28 = vpop.trf.xlu2 }
 0x20d   : > { %v890_v18 = vmul.f32 %v2117_v48, %v805_v28 }
 0x20e   : > { %1035 = vst [vmem:[%s2137_s25 + $0x1e8] sm:$0xff] %v971_v5 }
 0x20f   : > { %v957_v12 = vadd.f32 %v2122_v17, %v890_v18 }
 0x211   : > { %v836_v45 = vpop.trf.xlu0  ;;  %1021 = vst [vmem:[%s2137_s25 + $0x178] sm:$0xff] %v957_v12 }
 0x212   : > { %v905_v9 = vmul.f32 %v2117_v48, %v836_v45 }
 0x214   : > { %v972_v25 = vadd.f32 %v2122_v17, %v905_v9 }
 0x216   : > { %1036 = vst [vmem:[%s2137_s25 + $0x1f0] sm:$0xff] %v972_v25 }
 0x219   : > { %v837_v44 = vpop.trf.xlu0 }
 0x21a   : > { %v906_v29 = vmul.f32 %v2117_v48, %v837_v44 }
 0x21c   : > { %v973_v51 = vadd.f32 %v2122_v17, %v906_v29 }
 0x21e   : > { %1037 = vst [vmem:[%s2137_s25 + $0x1f8] sm:$0xff] %v973_v51 }
 0x21f   : > { %1366 = shalt.err (!%p1363_p0)
}
 0x220   : > { %s1447_s1 = smov 128   ;;  %s1448_s17 = smov 8  }
 0x221   : > { %1181 = dma.vmem_to_hbm [thread:$0]  (%p1531_p8), %s1054_s21, 8192, %s1056_s28, %s1039_s29, %s1447_s1, %s1447_s1, %s1448_s17  }
 0x222 PF: > { %s2530_s3 = sld [smem:[#allocation13_spill]] }
 0x223   : > { %s2531_s23 = sld [smem:[#allocation11_spill]] }
 0x228   : > { %p1198_p1 = scmp.ge.s32.totalorder %s2530_s3, 2 }
 0x229   : > { %s1070_s26 = sand.u32 1, %s2531_s23  }
 0x22a   : > { %p1192_p2 = pnand %p1198_p1, %p1535_p9  ;;  %s1071_s27 = scalar_lea.sflag [#allocation4], %s1070_s26 }
 0x22c   : > { %p1193_p4 = pneg %p1192_p2 }
 0x22e   : > { %1408 = dma.done.wait (%p1193_p4), %s1071_s27, 8192  }
 0x22f   : > { %1410 = vsyncadd (%p1193_p4), %s1071_s27, 4294959104  ;;  %s20_s4 = sadd.s32 1, %s2530_s3   ;;  %s2533_s15 = sld [smem:[#allocation12_spill]] }
 0x230   : > { %p17_p6 = scmp.ge.s32.totalorder %s20_s4, 6   ;;  %s2534_s17 = sld [smem:[#allocation16_spill]] }
 0x231   : > { %s2535_s12 = smov %s1417_s13  ;;  %s2536_s13 = smov %s1421_s14 }
 0x232   : > { %s2537_s14 = smov %s1579_s19  ;;  %s2538_s16 = smov %s1437_s18 }
 0x233   : > { %s2539_s18 = smov %s2546_s9  ;;  %s2540_s19 = smov %s20_s4 }
 0x234   :  { %19 = sbr.rel (!%p17_p6) target bundleno = 11 (0xb), region = 81 }
 0x239   :  { %1077 = vsyncpa [#allocation3], 1 }
 0x23a   :  { %1079 = vsyncpa [#allocation3 + $0x1], 1 }
 0x23b   :  { %1080 = vsyncpa [#allocation6], 1 }
 0x23c   :  { %1081 = vsyncpa [#allocation4], 1 }
 0x23d   :  { %1083 = vsyncpa [#allocation4 + $0x1], 1 }

</bundles_post_ra>
